<compile_context>
chip_gen: v6e
topology: v6e:2x2x1
jax: 0.10.0
libtpu: 0.0.40
codegen_flags: <defaults>
</compile_context>

<pallas_src>
import functools

import jax
import jax.numpy as jnp
from jax.experimental import pallas as pl
from jax.experimental.pallas import tpu as pltpu


def _spatial_attention_kernel(C, H, W, K, x_ref, w_ref, col_ref, o_ref, pad_ref):
    """Fused channel mean/max pool -> KxK conv -> sigmoid -> x * attn.

    x_ref   : (1, C, H*W)          lane-dense input block (VMEM)
    w_ref   : (2, K*K)             conv weight, index [c, kh*K + kw] (VMEM, f32)
    col_ref : (1, H*W)             flat pixel index % W, int32 (VMEM)
    o_ref   : (1, C, H*W)          lane-dense output block (VMEM)
    pad_ref : (2, H*W + 2*PADLEN)  f32 scratch: zero-padded (mean, max) maps
    """
    pad = (K - 1) // 2
    HW = H * W
    PADLEN = pad * W + pad          # absorbs the most negative / positive tap shift

    # ---- Channel pooling: one pass over the block in sublane groups of 8.
    #      f32 accumulation for the mean, running max in the input dtype
    #      (no full-block f32 copy).
    sum_f = jnp.zeros((1, HW), jnp.float32)
    max_v = None
    for c0 in range(0, C, 8):
        c1 = min(c0 + 8, C)
        chunk = x_ref[0, c0:c1, :]                                    # (<=8, HW)
        sum_f = sum_f + jnp.sum(chunk, axis=0, keepdims=True, dtype=jnp.float32)
        cmax = jnp.max(chunk, axis=0, keepdims=True)
        max_v = cmax if max_v is None else jnp.maximum(max_v, cmax)
    mean_f = sum_f * jnp.float32(1.0 / C)
    max_f = max_v.astype(jnp.float32)

    # ---- Zero-padded, stacked pooled maps in the flattened row-major domain.
    #      Row 0 = mean, row 1 = max.
    pad_ref[...] = jnp.zeros((2, HW + 2 * PADLEN), jnp.float32)
    pad_ref[0:1, PADLEN:PADLEN + HW] = mean_f
    pad_ref[1:2, PADLEN:PADLEN + HW] = max_f

    # ---- KxK conv as 49 shifted FMAs on the stacked (2, HW) slab.
    #      tap(kh, kw)[:, h*W + w] = pooled[:, (h+kh-pad)*W + (w+kw-pad)]
    #      Row overflow reads the zero pad; column wrap-around is masked once
    #      per kw (the mask is shared across kh).
    w2 = w_ref[...]                                                   # (2, K*K) f32
    col = col_ref[...]                                                # (1, HW) int32
    acc = jnp.zeros((2, HW), jnp.float32)
    for kw in range(K):
        dw = kw - pad
        part = jnp.zeros((2, HW), jnp.float32)
        for kh in range(K):
            off = PADLEN + (kh - pad) * W + dw
            tap = pad_ref[:, off:off + HW]                            # (2, HW)
            j = kh * K + kw
            part = part + tap * w2[:, j:j + 1]                        # (2,1) lane bcast
        if dw != 0:
            valid = jnp.logical_and(col >= -dw, col <= (W - 1) - dw)
            part = jnp.where(valid, part, 0.0)
        acc = acc + part

    conv = jnp.sum(acc, axis=0, keepdims=True)                        # (1, HW): mean+max
    attn = (1.0 / (1.0 + jnp.exp(-conv))).astype(o_ref.dtype)         # sigmoid, cast once

    # ---- Rescale: lane-dense broadcast multiply + store, per 8-channel group.
    for c0 in range(0, C, 8):
        c1 = min(c0 + 8, C)
        o_ref[0, c0:c1, :] = (x_ref[0, c0:c1, :] * attn).astype(o_ref.dtype)


def spatial_attention(x, weight, *, kernel_size=7):
    """SpatialAttention forward. x: (N, C, H, W) NCHW; weight: (1, 2, K, K) OIHW."""
    N, C, H, W = x.shape
    K = kernel_size
    pad = (K - 1) // 2
    assert weight.shape == (1, 2, K, K)
    HW = H * W
    PADLEN = pad * W + pad

    # Lane-dense views of the big tensors; free reshapes of contiguous NCHW.
    x_flat = x.reshape(N, C, HW)
    w2 = weight.reshape(2, K * K).astype(jnp.float32)
    # Column index of every flattened pixel, for the in-kernel border masks.
    col = (jnp.arange(HW, dtype=jnp.int32) % W).reshape(1, HW)

    kernel = functools.partial(_spatial_attention_kernel, C, H, W, K)

    # Size the scoped-VMEM budget from the actual blocks (in + out, each
    # double-buffered) so real feature maps don't trip the 16/32 MiB defaults.
    block_bytes = C * HW * x.dtype.itemsize
    vmem_limit = int(min(64 * 1024 * 1024,
                         max(32 * 1024 * 1024, 4 * block_bytes + (8 << 20))))

    out_flat = pl.pallas_call(
        kernel,
        out_shape=jax.ShapeDtypeStruct((N, C, HW), x.dtype),
        grid=(N,),
        in_specs=[
            pl.BlockSpec((1, C, HW), lambda n: (n, 0, 0)),   # x, lane-dense
            pl.BlockSpec((2, K * K), lambda n: (0, 0)),      # conv weight
            pl.BlockSpec((1, HW), lambda n: (0, 0)),         # column index
        ],
        out_specs=pl.BlockSpec((1, C, HW), lambda n: (n, 0, 0)),
        scratch_shapes=[pltpu.VMEM((2, HW + 2 * PADLEN), jnp.float32)],
        compiler_params=pltpu.CompilerParams(
            dimension_semantics=("parallel",),   # shard batch over TCs (v7x megacore)
            vmem_limit_bytes=vmem_limit,
        ),
    )(x_flat, w2, col)

    return out_flat.reshape(N, C, H, W)


class SpatialAttention:
    """JAX/Pallas equivalent of ultralytics SpatialAttention."""

    def __init__(self, kernel_size=7, *, key=None):
        kernel_size = 7  # module hard-codes 7 (padding 3)
        self.kernel_size = kernel_size
        if key is None:
            key = jax.random.PRNGKey(0)
        # Kaiming-uniform-style init (same fan-in rule as nn.Conv2d default).
        fan_in = 2 * kernel_size * kernel_size
        bound = 1.0 / (fan_in ** 0.5)
        self.weight = jax.random.uniform(
            key, (1, 2, kernel_size, kernel_size),
            dtype=jnp.float32, minval=-bound, maxval=bound)

    def __call__(self, x):
        return spatial_attention(x, self.weight, kernel_size=self.kernel_size)


if __name__ == "__main__":
    key = jax.random.PRNGKey(0)
    kx, kw = jax.random.split(key)

    N, C, H, W = 2, 4, 16, 16
    K = 7
    x = jax.random.normal(kx, (N, C, H, W), dtype=jnp.float32)

    module = SpatialAttention(kernel_size=K, key=kw)
    out = jax.block_until_ready(module(x))

    # Pure-JAX reference (identical math to the PyTorch module).
    mean = jnp.mean(x, axis=1, keepdims=True)
    mx = jnp.max(x, axis=1, keepdims=True)
    cat = jnp.concatenate([mean, mx], axis=1)
    conv = jax.lax.conv_general_dilated(
        cat, module.weight, window_strides=(1, 1),
        padding=((3, 3), (3, 3)),
        dimension_numbers=("NCHW", "OIHW", "NCHW"))
    ref = x * jax.nn.sigmoid(conv)

    assert out.shape == (N, C, H, W)
    assert out.dtype == x.dtype
    assert bool(jnp.allclose(out, ref, atol=1e-5, rtol=1e-5)), \
        float(jnp.max(jnp.abs(out - ref)))

    print("KERNEL_OK")
</pallas_src>

<mosaic_0001>
module attributes {stable_mosaic.version = 11 : i64} {
  func.func @_spatial_attention_kernel(%arg0: i32, %arg1: memref<1x4x256xf32, #tpu.memory_space<vmem>>, %arg2: memref<2x49xf32, #tpu.memory_space<vmem>>, %arg3: memref<1x256xi32, #tpu.memory_space<vmem>>, %arg4: memref<1x4x256xf32, #tpu.memory_space<vmem>>, %arg5: memref<2x358xf32, #tpu.memory_space<vmem>>) attributes {dimension_semantics = [#tpu.dimension_semantics<parallel>], iteration_bounds = array<i64: 2>, scalar_prefetch = 0 : i64, scratch_operands = 1 : i64, tpu.core_type = #tpu.core_type<tc>, window_params = [{transform_indices = @transform_0, window_bounds = array<i64: 1, 4, 256>}, {pipeline_mode = #tpu.pipeline_mode<synchronous>, transform_indices = @transform_1, window_bounds = array<i64: 2, 49>}, {pipeline_mode = #tpu.pipeline_mode<synchronous>, transform_indices = @transform_2, window_bounds = array<i64: 1, 256>}, {transform_indices = @transform_3, window_bounds = array<i64: 1, 4, 256>}]} {
    %cst = arith.constant 0.000000e+00 : f32
    %0 = vector.broadcast %cst : f32 to vector<1x256xf32>
    %c0 = arith.constant 0 : index
    %c0_0 = arith.constant 0 : index
    %c0_1 = arith.constant 0 : index
    %1 = vector.load %arg1[%c0, %c0_0, %c0_1] : memref<1x4x256xf32, #tpu.memory_space<vmem>>, vector<1x4x256xf32>
    %2 = vector.shape_cast %1 : vector<1x4x256xf32> to vector<4x256xf32>
    %cst_2 = arith.constant dense<0.000000e+00> : vector<256xf32>
    %3 = vector.multi_reduction <add>, %2, %cst_2 [0] : vector<4x256xf32> to vector<256xf32>
    %4 = vector.shape_cast %3 : vector<256xf32> to vector<1x256xf32>
    %5 = arith.addf %0, %4 : vector<1x256xf32>
    %cst_3 = arith.constant dense<0xFF800000> : vector<256xf32>
    %6 = vector.multi_reduction <maximumf>, %2, %cst_3 [0] : vector<4x256xf32> to vector<256xf32>
    %7 = vector.shape_cast %6 : vector<256xf32> to vector<1x256xf32>
    %cst_4 = arith.constant 2.500000e-01 : f32
    %8 = vector.broadcast %cst_4 : f32 to vector<1x256xf32>
    %9 = arith.mulf %5, %8 : vector<1x256xf32>
    %cst_5 = arith.constant 0.000000e+00 : f32
    %10 = vector.broadcast %cst_5 : f32 to vector<2x358xf32>
    %c0_6 = arith.constant 0 : index
    %c0_7 = arith.constant 0 : index
    %11 = vector.load %arg5[%c0_6, %c0_7] : memref<2x358xf32, #tpu.memory_space<vmem>>, vector<2x358xf32>
    tpu.vector_store %arg5[%c0_6, %c0_7], %10 {strides = array<i32>} : memref<2x358xf32, #tpu.memory_space<vmem>>, vector<2x358xf32>,
    %c0_8 = arith.constant 0 : index
    %c51 = arith.constant 51 : index
    %12 = vector.load %arg5[%c0_8, %c51] : memref<2x358xf32, #tpu.memory_space<vmem>>, vector<1x256xf32>
    tpu.vector_store %arg5[%c0_8, %c51], %9 {strides = array<i32>} : memref<2x358xf32, #tpu.memory_space<vmem>>, vector<1x256xf32>,
    %c1 = arith.constant 1 : index
    %c51_9 = arith.constant 51 : index
    %13 = vector.load %arg5[%c1, %c51_9] : memref<2x358xf32, #tpu.memory_space<vmem>>, vector<1x256xf32>
    tpu.vector_store %arg5[%c1, %c51_9], %7 {strides = array<i32>} : memref<2x358xf32, #tpu.memory_space<vmem>>, vector<1x256xf32>,
    %c0_10 = arith.constant 0 : index
    %c0_11 = arith.constant 0 : index
    %14 = vector.load %arg2[%c0_10, %c0_11] : memref<2x49xf32, #tpu.memory_space<vmem>>, vector<2x49xf32>
    %c0_12 = arith.constant 0 : index
    %c0_13 = arith.constant 0 : index
    %15 = vector.load %arg3[%c0_12, %c0_13] : memref<1x256xi32, #tpu.memory_space<vmem>>, vector<1x256xi32>
    %cst_14 = arith.constant 0.000000e+00 : f32
    %16 = vector.broadcast %cst_14 : f32 to vector<2x256xf32>
    %cst_15 = arith.constant 0.000000e+00 : f32
    %17 = vector.broadcast %cst_15 : f32 to vector<2x256xf32>
    %c0_16 = arith.constant 0 : index
    %c0_17 = arith.constant 0 : index
    %18 = vector.load %arg5[%c0_16, %c0_17] : memref<2x358xf32, #tpu.memory_space<vmem>>, vector<2x256xf32>
    %19 = vector.extract_strided_slice %14 {offsets = [0, 0], sizes = [2, 1], strides = [1, 1]} : vector<2x49xf32> to vector<2x1xf32>
    %20 = vector.broadcast %19 : vector<2x1xf32> to vector<2x256xf32>
    %21 = arith.mulf %18, %20 : vector<2x256xf32>
    %22 = arith.addf %17, %21 : vector<2x256xf32>
    %c0_18 = arith.constant 0 : index
    %c16 = arith.constant 16 : index
    %23 = vector.load %arg5[%c0_18, %c16] : memref<2x358xf32, #tpu.memory_space<vmem>>, vector<2x256xf32>
    %24 = vector.extract_strided_slice %14 {offsets = [0, 7], sizes = [2, 1], strides = [1, 1]} : vector<2x49xf32> to vector<2x1xf32>
    %25 = vector.broadcast %24 : vector<2x1xf32> to vector<2x256xf32>
    %26 = arith.mulf %23, %25 : vector<2x256xf32>
    %27 = arith.addf %22, %26 : vector<2x256xf32>
    %c0_19 = arith.constant 0 : index
    %c32 = arith.constant 32 : index
    %28 = vector.load %arg5[%c0_19, %c32] : memref<2x358xf32, #tpu.memory_space<vmem>>, vector<2x256xf32>
    %29 = vector.extract_strided_slice %14 {offsets = [0, 14], sizes = [2, 1], strides = [1, 1]} : vector<2x49xf32> to vector<2x1xf32>
    %30 = vector.broadcast %29 : vector<2x1xf32> to vector<2x256xf32>
    %31 = arith.mulf %28, %30 : vector<2x256xf32>
    %32 = arith.addf %27, %31 : vector<2x256xf32>
    %c0_20 = arith.constant 0 : index
    %c48 = arith.constant 48 : index
    %33 = vector.load %arg5[%c0_20, %c48] : memref<2x358xf32, #tpu.memory_space<vmem>>, vector<2x256xf32>
    %34 = vector.extract_strided_slice %14 {offsets = [0, 21], sizes = [2, 1], strides = [1, 1]} : vector<2x49xf32> to vector<2x1xf32>
    %35 = vector.broadcast %34 : vector<2x1xf32> to vector<2x256xf32>
    %36 = arith.mulf %33, %35 : vector<2x256xf32>
    %37 = arith.addf %32, %36 : vector<2x256xf32>
    %c0_21 = arith.constant 0 : index
    %c64 = arith.constant 64 : index
    %38 = vector.load %arg5[%c0_21, %c64] : memref<2x358xf32, #tpu.memory_space<vmem>>, vector<2x256xf32>
    %39 = vector.extract_strided_slice %14 {offsets = [0, 28], sizes = [2, 1], strides = [1, 1]} : vector<2x49xf32> to vector<2x1xf32>
    %40 = vector.broadcast %39 : vector<2x1xf32> to vector<2x256xf32>
    %41 = arith.mulf %38, %40 : vector<2x256xf32>
    %42 = arith.addf %37, %41 : vector<2x256xf32>
    %c0_22 = arith.constant 0 : index
    %c80 = arith.constant 80 : index
    %43 = vector.load %arg5[%c0_22, %c80] : memref<2x358xf32, #tpu.memory_space<vmem>>, vector<2x256xf32>
    %44 = vector.extract_strided_slice %14 {offsets = [0, 35], sizes = [2, 1], strides = [1, 1]} : vector<2x49xf32> to vector<2x1xf32>
    %45 = vector.broadcast %44 : vector<2x1xf32> to vector<2x256xf32>
    %46 = arith.mulf %43, %45 : vector<2x256xf32>
    %47 = arith.addf %42, %46 : vector<2x256xf32>
    %c0_23 = arith.constant 0 : index
    %c96 = arith.constant 96 : index
    %48 = vector.load %arg5[%c0_23, %c96] : memref<2x358xf32, #tpu.memory_space<vmem>>, vector<2x256xf32>
    %49 = vector.extract_strided_slice %14 {offsets = [0, 42], sizes = [2, 1], strides = [1, 1]} : vector<2x49xf32> to vector<2x1xf32>
    %50 = vector.broadcast %49 : vector<2x1xf32> to vector<2x256xf32>
    %51 = arith.mulf %48, %50 : vector<2x256xf32>
    %52 = arith.addf %47, %51 : vector<2x256xf32>
    %c3_i32 = arith.constant 3 : i32
    %53 = vector.broadcast %c3_i32 : i32 to vector<1x256xi32>
    %54 = arith.cmpi sge, %15, %53 : vector<1x256xi32>
    %c18_i32 = arith.constant 18 : i32
    %55 = vector.broadcast %c18_i32 : i32 to vector<1x256xi32>
    %56 = arith.cmpi sle, %15, %55 : vector<1x256xi32>
    %57 = arith.andi %54, %56 : vector<1x256xi1>
    %cst_24 = arith.constant 0.000000e+00 : f32
    %58 = vector.shape_cast %57 : vector<1x256xi1> to vector<1x256xi1>
    %59 = vector.broadcast %58 : vector<1x256xi1> to vector<2x256xi1>
    %60 = vector.broadcast %cst_24 : f32 to vector<2x256xf32>
    %61 = arith.select %59, %52, %60 : vector<2x256xi1>, vector<2x256xf32>
    %62 = arith.addf %16, %61 : vector<2x256xf32>
    %cst_25 = arith.constant 0.000000e+00 : f32
    %63 = vector.broadcast %cst_25 : f32 to vector<2x256xf32>
    %c0_26 = arith.constant 0 : index
    %c1_27 = arith.constant 1 : index
    %64 = vector.load %arg5[%c0_26, %c1_27] : memref<2x358xf32, #tpu.memory_space<vmem>>, vector<2x256xf32>
    %65 = vector.extract_strided_slice %14 {offsets = [0, 1], sizes = [2, 1], strides = [1, 1]} : vector<2x49xf32> to vector<2x1xf32>
    %66 = vector.broadcast %65 : vector<2x1xf32> to vector<2x256xf32>
    %67 = arith.mulf %64, %66 : vector<2x256xf32>
    %68 = arith.addf %63, %67 : vector<2x256xf32>
    %c0_28 = arith.constant 0 : index
    %c17 = arith.constant 17 : index
    %69 = vector.load %arg5[%c0_28, %c17] : memref<2x358xf32, #tpu.memory_space<vmem>>, vector<2x256xf32>
    %70 = vector.extract_strided_slice %14 {offsets = [0, 8], sizes = [2, 1], strides = [1, 1]} : vector<2x49xf32> to vector<2x1xf32>
    %71 = vector.broadcast %70 : vector<2x1xf32> to vector<2x256xf32>
    %72 = arith.mulf %69, %71 : vector<2x256xf32>
    %73 = arith.addf %68, %72 : vector<2x256xf32>
    %c0_29 = arith.constant 0 : index
    %c33 = arith.constant 33 : index
    %74 = vector.load %arg5[%c0_29, %c33] : memref<2x358xf32, #tpu.memory_space<vmem>>, vector<2x256xf32>
    %75 = vector.extract_strided_slice %14 {offsets = [0, 15], sizes = [2, 1], strides = [1, 1]} : vector<2x49xf32> to vector<2x1xf32>
    %76 = vector.broadcast %75 : vector<2x1xf32> to vector<2x256xf32>
    %77 = arith.mulf %74, %76 : vector<2x256xf32>
    %78 = arith.addf %73, %77 : vector<2x256xf32>
    %c0_30 = arith.constant 0 : index
    %c49 = arith.constant 49 : index
    %79 = vector.load %arg5[%c0_30, %c49] : memref<2x358xf32, #tpu.memory_space<vmem>>, vector<2x256xf32>
    %80 = vector.extract_strided_slice %14 {offsets = [0, 22], sizes = [2, 1], strides = [1, 1]} : vector<2x49xf32> to vector<2x1xf32>
    %81 = vector.broadcast %80 : vector<2x1xf32> to vector<2x256xf32>
    %82 = arith.mulf %79, %81 : vector<2x256xf32>
    %83 = arith.addf %78, %82 : vector<2x256xf32>
    %c0_31 = arith.constant 0 : index
    %c65 = arith.constant 65 : index
    %84 = vector.load %arg5[%c0_31, %c65] : memref<2x358xf32, #tpu.memory_space<vmem>>, vector<2x256xf32>
    %85 = vector.extract_strided_slice %14 {offsets = [0, 29], sizes = [2, 1], strides = [1, 1]} : vector<2x49xf32> to vector<2x1xf32>
    %86 = vector.broadcast %85 : vector<2x1xf32> to vector<2x256xf32>
    %87 = arith.mulf %84, %86 : vector<2x256xf32>
    %88 = arith.addf %83, %87 : vector<2x256xf32>
    %c0_32 = arith.constant 0 : index
    %c81 = arith.constant 81 : index
    %89 = vector.load %arg5[%c0_32, %c81] : memref<2x358xf32, #tpu.memory_space<vmem>>, vector<2x256xf32>
    %90 = vector.extract_strided_slice %14 {offsets = [0, 36], sizes = [2, 1], strides = [1, 1]} : vector<2x49xf32> to vector<2x1xf32>
    %91 = vector.broadcast %90 : vector<2x1xf32> to vector<2x256xf32>
    %92 = arith.mulf %89, %91 : vector<2x256xf32>
    %93 = arith.addf %88, %92 : vector<2x256xf32>
    %c0_33 = arith.constant 0 : index
    %c97 = arith.constant 97 : index
    %94 = vector.load %arg5[%c0_33, %c97] : memref<2x358xf32, #tpu.memory_space<vmem>>, vector<2x256xf32>
    %95 = vector.extract_strided_slice %14 {offsets = [0, 43], sizes = [2, 1], strides = [1, 1]} : vector<2x49xf32> to vector<2x1xf32>
    %96 = vector.broadcast %95 : vector<2x1xf32> to vector<2x256xf32>
    %97 = arith.mulf %94, %96 : vector<2x256xf32>
    %98 = arith.addf %93, %97 : vector<2x256xf32>
    %c2_i32 = arith.constant 2 : i32
    %99 = vector.broadcast %c2_i32 : i32 to vector<1x256xi32>
    %100 = arith.cmpi sge, %15, %99 : vector<1x256xi32>
    %c17_i32 = arith.constant 17 : i32
    %101 = vector.broadcast %c17_i32 : i32 to vector<1x256xi32>
    %102 = arith.cmpi sle, %15, %101 : vector<1x256xi32>
    %103 = arith.andi %100, %102 : vector<1x256xi1>
    %cst_34 = arith.constant 0.000000e+00 : f32
    %104 = vector.shape_cast %103 : vector<1x256xi1> to vector<1x256xi1>
    %105 = vector.broadcast %104 : vector<1x256xi1> to vector<2x256xi1>
    %106 = vector.broadcast %cst_34 : f32 to vector<2x256xf32>
    %107 = arith.select %105, %98, %106 : vector<2x256xi1>, vector<2x256xf32>
    %108 = arith.addf %62, %107 : vector<2x256xf32>
    %cst_35 = arith.constant 0.000000e+00 : f32
    %109 = vector.broadcast %cst_35 : f32 to vector<2x256xf32>
    %c0_36 = arith.constant 0 : index
    %c2 = arith.constant 2 : index
    %110 = vector.load %arg5[%c0_36, %c2] : memref<2x358xf32, #tpu.memory_space<vmem>>, vector<2x256xf32>
    %111 = vector.extract_strided_slice %14 {offsets = [0, 2], sizes = [2, 1], strides = [1, 1]} : vector<2x49xf32> to vector<2x1xf32>
    %112 = vector.broadcast %111 : vector<2x1xf32> to vector<2x256xf32>
    %113 = arith.mulf %110, %112 : vector<2x256xf32>
    %114 = arith.addf %109, %113 : vector<2x256xf32>
    %c0_37 = arith.constant 0 : index
    %c18 = arith.constant 18 : index
    %115 = vector.load %arg5[%c0_37, %c18] : memref<2x358xf32, #tpu.memory_space<vmem>>, vector<2x256xf32>
    %116 = vector.extract_strided_slice %14 {offsets = [0, 9], sizes = [2, 1], strides = [1, 1]} : vector<2x49xf32> to vector<2x1xf32>
    %117 = vector.broadcast %116 : vector<2x1xf32> to vector<2x256xf32>
    %118 = arith.mulf %115, %117 : vector<2x256xf32>
    %119 = arith.addf %114, %118 : vector<2x256xf32>
    %c0_38 = arith.constant 0 : index
    %c34 = arith.constant 34 : index
    %120 = vector.load %arg5[%c0_38, %c34] : memref<2x358xf32, #tpu.memory_space<vmem>>, vector<2x256xf32>
    %121 = vector.extract_strided_slice %14 {offsets = [0, 16], sizes = [2, 1], strides = [1, 1]} : vector<2x49xf32> to vector<2x1xf32>
    %122 = vector.broadcast %121 : vector<2x1xf32> to vector<2x256xf32>
    %123 = arith.mulf %120, %122 : vector<2x256xf32>
    %124 = arith.addf %119, %123 : vector<2x256xf32>
    %c0_39 = arith.constant 0 : index
    %c50 = arith.constant 50 : index
    %125 = vector.load %arg5[%c0_39, %c50] : memref<2x358xf32, #tpu.memory_space<vmem>>, vector<2x256xf32>
    %126 = vector.extract_strided_slice %14 {offsets = [0, 23], sizes = [2, 1], strides = [1, 1]} : vector<2x49xf32> to vector<2x1xf32>
    %127 = vector.broadcast %126 : vector<2x1xf32> to vector<2x256xf32>
    %128 = arith.mulf %125, %127 : vector<2x256xf32>
    %129 = arith.addf %124, %128 : vector<2x256xf32>
    %c0_40 = arith.constant 0 : index
    %c66 = arith.constant 66 : index
    %130 = vector.load %arg5[%c0_40, %c66] : memref<2x358xf32, #tpu.memory_space<vmem>>, vector<2x256xf32>
    %131 = vector.extract_strided_slice %14 {offsets = [0, 30], sizes = [2, 1], strides = [1, 1]} : vector<2x49xf32> to vector<2x1xf32>
    %132 = vector.broadcast %131 : vector<2x1xf32> to vector<2x256xf32>
    %133 = arith.mulf %130, %132 : vector<2x256xf32>
    %134 = arith.addf %129, %133 : vector<2x256xf32>
    %c0_41 = arith.constant 0 : index
    %c82 = arith.constant 82 : index
    %135 = vector.load %arg5[%c0_41, %c82] : memref<2x358xf32, #tpu.memory_space<vmem>>, vector<2x256xf32>
    %136 = vector.extract_strided_slice %14 {offsets = [0, 37], sizes = [2, 1], strides = [1, 1]} : vector<2x49xf32> to vector<2x1xf32>
    %137 = vector.broadcast %136 : vector<2x1xf32> to vector<2x256xf32>
    %138 = arith.mulf %135, %137 : vector<2x256xf32>
    %139 = arith.addf %134, %138 : vector<2x256xf32>
    %c0_42 = arith.constant 0 : index
    %c98 = arith.constant 98 : index
    %140 = vector.load %arg5[%c0_42, %c98] : memref<2x358xf32, #tpu.memory_space<vmem>>, vector<2x256xf32>
    %141 = vector.extract_strided_slice %14 {offsets = [0, 44], sizes = [2, 1], strides = [1, 1]} : vector<2x49xf32> to vector<2x1xf32>
    %142 = vector.broadcast %141 : vector<2x1xf32> to vector<2x256xf32>
    %143 = arith.mulf %140, %142 : vector<2x256xf32>
    %144 = arith.addf %139, %143 : vector<2x256xf32>
    %c1_i32 = arith.constant 1 : i32
    %145 = vector.broadcast %c1_i32 : i32 to vector<1x256xi32>
    %146 = arith.cmpi sge, %15, %145 : vector<1x256xi32>
    %c16_i32 = arith.constant 16 : i32
    %147 = vector.broadcast %c16_i32 : i32 to vector<1x256xi32>
    %148 = arith.cmpi sle, %15, %147 : vector<1x256xi32>
    %149 = arith.andi %146, %148 : vector<1x256xi1>
    %cst_43 = arith.constant 0.000000e+00 : f32
    %150 = vector.shape_cast %149 : vector<1x256xi1> to vector<1x256xi1>
    %151 = vector.broadcast %150 : vector<1x256xi1> to vector<2x256xi1>
    %152 = vector.broadcast %cst_43 : f32 to vector<2x256xf32>
    %153 = arith.select %151, %144, %152 : vector<2x256xi1>, vector<2x256xf32>
    %154 = arith.addf %108, %153 : vector<2x256xf32>
    %cst_44 = arith.constant 0.000000e+00 : f32
    %155 = vector.broadcast %cst_44 : f32 to vector<2x256xf32>
    %c0_45 = arith.constant 0 : index
    %c3 = arith.constant 3 : index
    %156 = vector.load %arg5[%c0_45, %c3] : memref<2x358xf32, #tpu.memory_space<vmem>>, vector<2x256xf32>
    %157 = vector.extract_strided_slice %14 {offsets = [0, 3], sizes = [2, 1], strides = [1, 1]} : vector<2x49xf32> to vector<2x1xf32>
    %158 = vector.broadcast %157 : vector<2x1xf32> to vector<2x256xf32>
    %159 = arith.mulf %156, %158 : vector<2x256xf32>
    %160 = arith.addf %155, %159 : vector<2x256xf32>
    %c0_46 = arith.constant 0 : index
    %c19 = arith.constant 19 : index
    %161 = vector.load %arg5[%c0_46, %c19] : memref<2x358xf32, #tpu.memory_space<vmem>>, vector<2x256xf32>
    %162 = vector.extract_strided_slice %14 {offsets = [0, 10], sizes = [2, 1], strides = [1, 1]} : vector<2x49xf32> to vector<2x1xf32>
    %163 = vector.broadcast %162 : vector<2x1xf32> to vector<2x256xf32>
    %164 = arith.mulf %161, %163 : vector<2x256xf32>
    %165 = arith.addf %160, %164 : vector<2x256xf32>
    %c0_47 = arith.constant 0 : index
    %c35 = arith.constant 35 : index
    %166 = vector.load %arg5[%c0_47, %c35] : memref<2x358xf32, #tpu.memory_space<vmem>>, vector<2x256xf32>
    %167 = vector.extract_strided_slice %14 {offsets = [0, 17], sizes = [2, 1], strides = [1, 1]} : vector<2x49xf32> to vector<2x1xf32>
    %168 = vector.broadcast %167 : vector<2x1xf32> to vector<2x256xf32>
    %169 = arith.mulf %166, %168 : vector<2x256xf32>
    %170 = arith.addf %165, %169 : vector<2x256xf32>
    %c0_48 = arith.constant 0 : index
    %c51_49 = arith.constant 51 : index
    %171 = vector.load %arg5[%c0_48, %c51_49] : memref<2x358xf32, #tpu.memory_space<vmem>>, vector<2x256xf32>
    %172 = vector.extract_strided_slice %14 {offsets = [0, 24], sizes = [2, 1], strides = [1, 1]} : vector<2x49xf32> to vector<2x1xf32>
    %173 = vector.broadcast %172 : vector<2x1xf32> to vector<2x256xf32>
    %174 = arith.mulf %171, %173 : vector<2x256xf32>
    %175 = arith.addf %170, %174 : vector<2x256xf32>
    %c0_50 = arith.constant 0 : index
    %c67 = arith.constant 67 : index
    %176 = vector.load %arg5[%c0_50, %c67] : memref<2x358xf32, #tpu.memory_space<vmem>>, vector<2x256xf32>
    %177 = vector.extract_strided_slice %14 {offsets = [0, 31], sizes = [2, 1], strides = [1, 1]} : vector<2x49xf32> to vector<2x1xf32>
    %178 = vector.broadcast %177 : vector<2x1xf32> to vector<2x256xf32>
    %179 = arith.mulf %176, %178 : vector<2x256xf32>
    %180 = arith.addf %175, %179 : vector<2x256xf32>
    %c0_51 = arith.constant 0 : index
    %c83 = arith.constant 83 : index
    %181 = vector.load %arg5[%c0_51, %c83] : memref<2x358xf32, #tpu.memory_space<vmem>>, vector<2x256xf32>
    %182 = vector.extract_strided_slice %14 {offsets = [0, 38], sizes = [2, 1], strides = [1, 1]} : vector<2x49xf32> to vector<2x1xf32>
    %183 = vector.broadcast %182 : vector<2x1xf32> to vector<2x256xf32>
    %184 = arith.mulf %181, %183 : vector<2x256xf32>
    %185 = arith.addf %180, %184 : vector<2x256xf32>
    %c0_52 = arith.constant 0 : index
    %c99 = arith.constant 99 : index
    %186 = vector.load %arg5[%c0_52, %c99] : memref<2x358xf32, #tpu.memory_space<vmem>>, vector<2x256xf32>
    %187 = vector.extract_strided_slice %14 {offsets = [0, 45], sizes = [2, 1], strides = [1, 1]} : vector<2x49xf32> to vector<2x1xf32>
    %188 = vector.broadcast %187 : vector<2x1xf32> to vector<2x256xf32>
    %189 = arith.mulf %186, %188 : vector<2x256xf32>
    %190 = arith.addf %185, %189 : vector<2x256xf32>
    %191 = arith.addf %154, %190 : vector<2x256xf32>
    %cst_53 = arith.constant 0.000000e+00 : f32
    %192 = vector.broadcast %cst_53 : f32 to vector<2x256xf32>
    %c0_54 = arith.constant 0 : index
    %c4 = arith.constant 4 : index
    %193 = vector.load %arg5[%c0_54, %c4] : memref<2x358xf32, #tpu.memory_space<vmem>>, vector<2x256xf32>
    %194 = vector.extract_strided_slice %14 {offsets = [0, 4], sizes = [2, 1], strides = [1, 1]} : vector<2x49xf32> to vector<2x1xf32>
    %195 = vector.broadcast %194 : vector<2x1xf32> to vector<2x256xf32>
    %196 = arith.mulf %193, %195 : vector<2x256xf32>
    %197 = arith.addf %192, %196 : vector<2x256xf32>
    %c0_55 = arith.constant 0 : index
    %c20 = arith.constant 20 : index
    %198 = vector.load %arg5[%c0_55, %c20] : memref<2x358xf32, #tpu.memory_space<vmem>>, vector<2x256xf32>
    %199 = vector.extract_strided_slice %14 {offsets = [0, 11], sizes = [2, 1], strides = [1, 1]} : vector<2x49xf32> to vector<2x1xf32>
    %200 = vector.broadcast %199 : vector<2x1xf32> to vector<2x256xf32>
    %201 = arith.mulf %198, %200 : vector<2x256xf32>
    %202 = arith.addf %197, %201 : vector<2x256xf32>
    %c0_56 = arith.constant 0 : index
    %c36 = arith.constant 36 : index
    %203 = vector.load %arg5[%c0_56, %c36] : memref<2x358xf32, #tpu.memory_space<vmem>>, vector<2x256xf32>
    %204 = vector.extract_strided_slice %14 {offsets = [0, 18], sizes = [2, 1], strides = [1, 1]} : vector<2x49xf32> to vector<2x1xf32>
    %205 = vector.broadcast %204 : vector<2x1xf32> to vector<2x256xf32>
    %206 = arith.mulf %203, %205 : vector<2x256xf32>
    %207 = arith.addf %202, %206 : vector<2x256xf32>
    %c0_57 = arith.constant 0 : index
    %c52 = arith.constant 52 : index
    %208 = vector.load %arg5[%c0_57, %c52] : memref<2x358xf32, #tpu.memory_space<vmem>>, vector<2x256xf32>
    %209 = vector.extract_strided_slice %14 {offsets = [0, 25], sizes = [2, 1], strides = [1, 1]} : vector<2x49xf32> to vector<2x1xf32>
    %210 = vector.broadcast %209 : vector<2x1xf32> to vector<2x256xf32>
    %211 = arith.mulf %208, %210 : vector<2x256xf32>
    %212 = arith.addf %207, %211 : vector<2x256xf32>
    %c0_58 = arith.constant 0 : index
    %c68 = arith.constant 68 : index
    %213 = vector.load %arg5[%c0_58, %c68] : memref<2x358xf32, #tpu.memory_space<vmem>>, vector<2x256xf32>
    %214 = vector.extract_strided_slice %14 {offsets = [0, 32], sizes = [2, 1], strides = [1, 1]} : vector<2x49xf32> to vector<2x1xf32>
    %215 = vector.broadcast %214 : vector<2x1xf32> to vector<2x256xf32>
    %216 = arith.mulf %213, %215 : vector<2x256xf32>
    %217 = arith.addf %212, %216 : vector<2x256xf32>
    %c0_59 = arith.constant 0 : index
    %c84 = arith.constant 84 : index
    %218 = vector.load %arg5[%c0_59, %c84] : memref<2x358xf32, #tpu.memory_space<vmem>>, vector<2x256xf32>
    %219 = vector.extract_strided_slice %14 {offsets = [0, 39], sizes = [2, 1], strides = [1, 1]} : vector<2x49xf32> to vector<2x1xf32>
    %220 = vector.broadcast %219 : vector<2x1xf32> to vector<2x256xf32>
    %221 = arith.mulf %218, %220 : vector<2x256xf32>
    %222 = arith.addf %217, %221 : vector<2x256xf32>
    %c0_60 = arith.constant 0 : index
    %c100 = arith.constant 100 : index
    %223 = vector.load %arg5[%c0_60, %c100] : memref<2x358xf32, #tpu.memory_space<vmem>>, vector<2x256xf32>
    %224 = vector.extract_strided_slice %14 {offsets = [0, 46], sizes = [2, 1], strides = [1, 1]} : vector<2x49xf32> to vector<2x1xf32>
    %225 = vector.broadcast %224 : vector<2x1xf32> to vector<2x256xf32>
    %226 = arith.mulf %223, %225 : vector<2x256xf32>
    %227 = arith.addf %222, %226 : vector<2x256xf32>
    %c-1_i32 = arith.constant -1 : i32
    %228 = vector.broadcast %c-1_i32 : i32 to vector<1x256xi32>
    %229 = arith.cmpi sge, %15, %228 : vector<1x256xi32>
    %c14_i32 = arith.constant 14 : i32
    %230 = vector.broadcast %c14_i32 : i32 to vector<1x256xi32>
    %231 = arith.cmpi sle, %15, %230 : vector<1x256xi32>
    %232 = arith.andi %229, %231 : vector<1x256xi1>
    %cst_61 = arith.constant 0.000000e+00 : f32
    %233 = vector.shape_cast %232 : vector<1x256xi1> to vector<1x256xi1>
    %234 = vector.broadcast %233 : vector<1x256xi1> to vector<2x256xi1>
    %235 = vector.broadcast %cst_61 : f32 to vector<2x256xf32>
    %236 = arith.select %234, %227, %235 : vector<2x256xi1>, vector<2x256xf32>
    %237 = arith.addf %191, %236 : vector<2x256xf32>
    %cst_62 = arith.constant 0.000000e+00 : f32
    %238 = vector.broadcast %cst_62 : f32 to vector<2x256xf32>
    %c0_63 = arith.constant 0 : index
    %c5 = arith.constant 5 : index
    %239 = vector.load %arg5[%c0_63, %c5] : memref<2x358xf32, #tpu.memory_space<vmem>>, vector<2x256xf32>
    %240 = vector.extract_strided_slice %14 {offsets = [0, 5], sizes = [2, 1], strides = [1, 1]} : vector<2x49xf32> to vector<2x1xf32>
    %241 = vector.broadcast %240 : vector<2x1xf32> to vector<2x256xf32>
    %242 = arith.mulf %239, %241 : vector<2x256xf32>
    %243 = arith.addf %238, %242 : vector<2x256xf32>
    %c0_64 = arith.constant 0 : index
    %c21 = arith.constant 21 : index
    %244 = vector.load %arg5[%c0_64, %c21] : memref<2x358xf32, #tpu.memory_space<vmem>>, vector<2x256xf32>
    %245 = vector.extract_strided_slice %14 {offsets = [0, 12], sizes = [2, 1], strides = [1, 1]} : vector<2x49xf32> to vector<2x1xf32>
    %246 = vector.broadcast %245 : vector<2x1xf32> to vector<2x256xf32>
    %247 = arith.mulf %244, %246 : vector<2x256xf32>
    %248 = arith.addf %243, %247 : vector<2x256xf32>
    %c0_65 = arith.constant 0 : index
    %c37 = arith.constant 37 : index
    %249 = vector.load %arg5[%c0_65, %c37] : memref<2x358xf32, #tpu.memory_space<vmem>>, vector<2x256xf32>
    %250 = vector.extract_strided_slice %14 {offsets = [0, 19], sizes = [2, 1], strides = [1, 1]} : vector<2x49xf32> to vector<2x1xf32>
    %251 = vector.broadcast %250 : vector<2x1xf32> to vector<2x256xf32>
    %252 = arith.mulf %249, %251 : vector<2x256xf32>
    %253 = arith.addf %248, %252 : vector<2x256xf32>
    %c0_66 = arith.constant 0 : index
    %c53 = arith.constant 53 : index
    %254 = vector.load %arg5[%c0_66, %c53] : memref<2x358xf32, #tpu.memory_space<vmem>>, vector<2x256xf32>
    %255 = vector.extract_strided_slice %14 {offsets = [0, 26], sizes = [2, 1], strides = [1, 1]} : vector<2x49xf32> to vector<2x1xf32>
    %256 = vector.broadcast %255 : vector<2x1xf32> to vector<2x256xf32>
    %257 = arith.mulf %254, %256 : vector<2x256xf32>
    %258 = arith.addf %253, %257 : vector<2x256xf32>
    %c0_67 = arith.constant 0 : index
    %c69 = arith.constant 69 : index
    %259 = vector.load %arg5[%c0_67, %c69] : memref<2x358xf32, #tpu.memory_space<vmem>>, vector<2x256xf32>
    %260 = vector.extract_strided_slice %14 {offsets = [0, 33], sizes = [2, 1], strides = [1, 1]} : vector<2x49xf32> to vector<2x1xf32>
    %261 = vector.broadcast %260 : vector<2x1xf32> to vector<2x256xf32>
    %262 = arith.mulf %259, %261 : vector<2x256xf32>
    %263 = arith.addf %258, %262 : vector<2x256xf32>
    %c0_68 = arith.constant 0 : index
    %c85 = arith.constant 85 : index
    %264 = vector.load %arg5[%c0_68, %c85] : memref<2x358xf32, #tpu.memory_space<vmem>>, vector<2x256xf32>
    %265 = vector.extract_strided_slice %14 {offsets = [0, 40], sizes = [2, 1], strides = [1, 1]} : vector<2x49xf32> to vector<2x1xf32>
    %266 = vector.broadcast %265 : vector<2x1xf32> to vector<2x256xf32>
    %267 = arith.mulf %264, %266 : vector<2x256xf32>
    %268 = arith.addf %263, %267 : vector<2x256xf32>
    %c0_69 = arith.constant 0 : index
    %c101 = arith.constant 101 : index
    %269 = vector.load %arg5[%c0_69, %c101] : memref<2x358xf32, #tpu.memory_space<vmem>>, vector<2x256xf32>
    %270 = vector.extract_strided_slice %14 {offsets = [0, 47], sizes = [2, 1], strides = [1, 1]} : vector<2x49xf32> to vector<2x1xf32>
    %271 = vector.broadcast %270 : vector<2x1xf32> to vector<2x256xf32>
    %272 = arith.mulf %269, %271 : vector<2x256xf32>
    %273 = arith.addf %268, %272 : vector<2x256xf32>
    %c-2_i32 = arith.constant -2 : i32
    %274 = vector.broadcast %c-2_i32 : i32 to vector<1x256xi32>
    %275 = arith.cmpi sge, %15, %274 : vector<1x256xi32>
    %c13_i32 = arith.constant 13 : i32
    %276 = vector.broadcast %c13_i32 : i32 to vector<1x256xi32>
    %277 = arith.cmpi sle, %15, %276 : vector<1x256xi32>
    %278 = arith.andi %275, %277 : vector<1x256xi1>
    %cst_70 = arith.constant 0.000000e+00 : f32
    %279 = vector.shape_cast %278 : vector<1x256xi1> to vector<1x256xi1>
    %280 = vector.broadcast %279 : vector<1x256xi1> to vector<2x256xi1>
    %281 = vector.broadcast %cst_70 : f32 to vector<2x256xf32>
    %282 = arith.select %280, %273, %281 : vector<2x256xi1>, vector<2x256xf32>
    %283 = arith.addf %237, %282 : vector<2x256xf32>
    %cst_71 = arith.constant 0.000000e+00 : f32
    %284 = vector.broadcast %cst_71 : f32 to vector<2x256xf32>
    %c0_72 = arith.constant 0 : index
    %c6 = arith.constant 6 : index
    %285 = vector.load %arg5[%c0_72, %c6] : memref<2x358xf32, #tpu.memory_space<vmem>>, vector<2x256xf32>
    %286 = vector.extract_strided_slice %14 {offsets = [0, 6], sizes = [2, 1], strides = [1, 1]} : vector<2x49xf32> to vector<2x1xf32>
    %287 = vector.broadcast %286 : vector<2x1xf32> to vector<2x256xf32>
    %288 = arith.mulf %285, %287 : vector<2x256xf32>
    %289 = arith.addf %284, %288 : vector<2x256xf32>
    %c0_73 = arith.constant 0 : index
    %c22 = arith.constant 22 : index
    %290 = vector.load %arg5[%c0_73, %c22] : memref<2x358xf32, #tpu.memory_space<vmem>>, vector<2x256xf32>
    %291 = vector.extract_strided_slice %14 {offsets = [0, 13], sizes = [2, 1], strides = [1, 1]} : vector<2x49xf32> to vector<2x1xf32>
    %292 = vector.broadcast %291 : vector<2x1xf32> to vector<2x256xf32>
    %293 = arith.mulf %290, %292 : vector<2x256xf32>
    %294 = arith.addf %289, %293 : vector<2x256xf32>
    %c0_74 = arith.constant 0 : index
    %c38 = arith.constant 38 : index
    %295 = vector.load %arg5[%c0_74, %c38] : memref<2x358xf32, #tpu.memory_space<vmem>>, vector<2x256xf32>
    %296 = vector.extract_strided_slice %14 {offsets = [0, 20], sizes = [2, 1], strides = [1, 1]} : vector<2x49xf32> to vector<2x1xf32>
    %297 = vector.broadcast %296 : vector<2x1xf32> to vector<2x256xf32>
    %298 = arith.mulf %295, %297 : vector<2x256xf32>
    %299 = arith.addf %294, %298 : vector<2x256xf32>
    %c0_75 = arith.constant 0 : index
    %c54 = arith.constant 54 : index
    %300 = vector.load %arg5[%c0_75, %c54] : memref<2x358xf32, #tpu.memory_space<vmem>>, vector<2x256xf32>
    %301 = vector.extract_strided_slice %14 {offsets = [0, 27], sizes = [2, 1], strides = [1, 1]} : vector<2x49xf32> to vector<2x1xf32>
    %302 = vector.broadcast %301 : vector<2x1xf32> to vector<2x256xf32>
    %303 = arith.mulf %300, %302 : vector<2x256xf32>
    %304 = arith.addf %299, %303 : vector<2x256xf32>
    %c0_76 = arith.constant 0 : index
    %c70 = arith.constant 70 : index
    %305 = vector.load %arg5[%c0_76, %c70] : memref<2x358xf32, #tpu.memory_space<vmem>>, vector<2x256xf32>
    %306 = vector.extract_strided_slice %14 {offsets = [0, 34], sizes = [2, 1], strides = [1, 1]} : vector<2x49xf32> to vector<2x1xf32>
    %307 = vector.broadcast %306 : vector<2x1xf32> to vector<2x256xf32>
    %308 = arith.mulf %305, %307 : vector<2x256xf32>
    %309 = arith.addf %304, %308 : vector<2x256xf32>
    %c0_77 = arith.constant 0 : index
    %c86 = arith.constant 86 : index
    %310 = vector.load %arg5[%c0_77, %c86] : memref<2x358xf32, #tpu.memory_space<vmem>>, vector<2x256xf32>
    %311 = vector.extract_strided_slice %14 {offsets = [0, 41], sizes = [2, 1], strides = [1, 1]} : vector<2x49xf32> to vector<2x1xf32>
    %312 = vector.broadcast %311 : vector<2x1xf32> to vector<2x256xf32>
    %313 = arith.mulf %310, %312 : vector<2x256xf32>
    %314 = arith.addf %309, %313 : vector<2x256xf32>
    %c0_78 = arith.constant 0 : index
    %c102 = arith.constant 102 : index
    %315 = vector.load %arg5[%c0_78, %c102] : memref<2x358xf32, #tpu.memory_space<vmem>>, vector<2x256xf32>
    %316 = vector.extract_strided_slice %14 {offsets = [0, 48], sizes = [2, 1], strides = [1, 1]} : vector<2x49xf32> to vector<2x1xf32>
    %317 = vector.broadcast %316 : vector<2x1xf32> to vector<2x256xf32>
    %318 = arith.mulf %315, %317 : vector<2x256xf32>
    %319 = arith.addf %314, %318 : vector<2x256xf32>
    %c-3_i32 = arith.constant -3 : i32
    %320 = vector.broadcast %c-3_i32 : i32 to vector<1x256xi32>
    %321 = arith.cmpi sge, %15, %320 : vector<1x256xi32>
    %c12_i32 = arith.constant 12 : i32
    %322 = vector.broadcast %c12_i32 : i32 to vector<1x256xi32>
    %323 = arith.cmpi sle, %15, %322 : vector<1x256xi32>
    %324 = arith.andi %321, %323 : vector<1x256xi1>
    %cst_79 = arith.constant 0.000000e+00 : f32
    %325 = vector.shape_cast %324 : vector<1x256xi1> to vector<1x256xi1>
    %326 = vector.broadcast %325 : vector<1x256xi1> to vector<2x256xi1>
    %327 = vector.broadcast %cst_79 : f32 to vector<2x256xf32>
    %328 = arith.select %326, %319, %327 : vector<2x256xi1>, vector<2x256xf32>
    %329 = arith.addf %283, %328 : vector<2x256xf32>
    %cst_80 = arith.constant dense<0.000000e+00> : vector<256xf32>
    %330 = vector.multi_reduction <add>, %329, %cst_80 [0] : vector<2x256xf32> to vector<256xf32>
    %331 = vector.shape_cast %330 : vector<256xf32> to vector<1x256xf32>
    %cst_81 = arith.constant 0.000000e+00 : f32
    %332 = vector.broadcast %cst_81 : f32 to vector<1x256xf32>
    %333 = arith.subf %332, %331 : vector<1x256xf32>
    %334 = math.exp %333 : vector<1x256xf32>
    %cst_82 = arith.constant 1.000000e+00 : f32
    %335 = vector.broadcast %cst_82 : f32 to vector<1x256xf32>
    %336 = arith.addf %335, %334 : vector<1x256xf32>
    %cst_83 = arith.constant 1.000000e+00 : f32
    %337 = vector.broadcast %cst_83 : f32 to vector<1x256xf32>
    %338 = arith.divf %337, %336 : vector<1x256xf32>
    %c0_84 = arith.constant 0 : index
    %c0_85 = arith.constant 0 : index
    %c0_86 = arith.constant 0 : index
    %339 = vector.load %arg1[%c0_84, %c0_85, %c0_86] : memref<1x4x256xf32, #tpu.memory_space<vmem>>, vector<1x4x256xf32>
    %340 = vector.shape_cast %339 : vector<1x4x256xf32> to vector<4x256xf32>
    %341 = vector.broadcast %338 : vector<1x256xf32> to vector<4x256xf32>
    %342 = arith.mulf %340, %341 : vector<4x256xf32>
    %c0_87 = arith.constant 0 : index
    %c0_88 = arith.constant 0 : index
    %c0_89 = arith.constant 0 : index
    %343 = vector.load %arg4[%c0_87, %c0_88, %c0_89] : memref<1x4x256xf32, #tpu.memory_space<vmem>>, vector<1x4x256xf32>
    %344 = vector.shape_cast %343 : vector<1x4x256xf32> to vector<4x256xf32>
    %345 = vector.shape_cast %342 : vector<4x256xf32> to vector<1x4x256xf32>
    tpu.vector_store %arg4[%c0_87, %c0_88, %c0_89], %345 {strides = array<i32>} : memref<1x4x256xf32, #tpu.memory_space<vmem>>, vector<1x4x256xf32>,
    return
  }
  func.func @transform_0(%arg0: i32) -> (i32, i32, i32) {
    %c0_i32 = arith.constant 0 : i32
    %c0_i32_0 = arith.constant 0 : i32
    %c0_i32_1 = arith.constant 0 : i32
    return %arg0, %c0_i32, %c0_i32_0 : i32, i32, i32
  }
  func.func @transform_1(%arg0: i32) -> (i32, i32) {
    %c0_i32 = arith.constant 0 : i32
    %c0_i32_0 = arith.constant 0 : i32
    %c0_i32_1 = arith.constant 0 : i32
    return %c0_i32, %c0_i32_0 : i32, i32
  }
  func.func @transform_2(%arg0: i32) -> (i32, i32) {
    %c0_i32 = arith.constant 0 : i32
    %c0_i32_0 = arith.constant 0 : i32
    %c0_i32_1 = arith.constant 0 : i32
    return %c0_i32, %c0_i32_0 : i32, i32
  }
  func.func @transform_3(%arg0: i32) -> (i32, i32, i32) {
    %c0_i32 = arith.constant 0 : i32
    %c0_i32_0 = arith.constant 0 : i32
    %c0_i32_1 = arith.constant 0 : i32
    return %arg0, %c0_i32, %c0_i32_0 : i32, i32, i32
  }
}

</mosaic_0001>

<bundles_post_ra>
// kernel: tpu_custom_call.1
= control target key start
LH: loop header
LB: loop body
LE: loop exit
PB: predicated region body
PF: predicated region fallthrough
CT: control target
= control target key end

     0   :  { %8 = vsyncpa [#allocation4], 0  ;;  %s2712_s0 = inlined_call_operand.hbm [shape: f32[2,4,256], index: 0, kind: input, shape index: {}]   ;;  %s2713_s1 = inlined_call_operand.hbm [shape: f32[2,49], index: 1, kind: input, shape index: {}]   ;;  %s2714_s2 = inlined_call_operand.vmem [shape: s32[1,256], index: 2, kind: input, shape index: {}]   ;;  %s2715_s3 = inlined_call_operand.hbm [shape: f32[2,4,256], index: 3, kind: output, shape index: {}]  }
   0x1   :  { %10 = vsyncpa [#allocation4 + $0x1], 0 }
   0x2   :  { %11 = vsyncpa [#allocation7], 0 }
   0x3   :  { %12 = vsyncpa [#allocation5], 0 }
   0x4   :  { %14 = vsyncpa [#allocation5 + $0x1], 0  ;;  %s2031_s12 = smov 0   ;;  %s2033_s13 = smov 0  }
   0x5   :  { %s2035_s14 = smov 0   ;;  %s2037_s15 = smov 0  }
   0x6 LB: > { %s2052_s16 = sadd.s32 4294967295, %s1940_s15   ;;  %s1618_s17 = sadd.s32 4294967294, %s1940_s15   ;;  %s1940_s15 = sphi %s2037_s15, %s2760_s15   ;;  %s1936_s14 = sphi %s2035_s14, %s2759_s14   ;;  %s1932_s13 = sphi %s2033_s13, %s2758_s13   ;;  %s1928_s12 = sphi %s2031_s12, %s2757_s12  }
   0x7   : > { %p40_p0 = scmp.ne.s32.totalorder %s1932_s13, %s1928_s12  ;;  %p2716_p1 = scmp.eq.s32.totalorder %s2052_s16, 0 }
   0x8   : > { %p112_p3 = scmp.eq.s32.totalorder %s1618_s17, 1  ;;  %p1619_p5 = scmp.ge.s32.totalorder %s1940_s15, 1 }
   0x9   : > { %p2061_p4 = por %p2716_p1, %p40_p0  ;;  %p119_p7 = scmp.lt.s32.totalorder %s1940_s15, 3 }
   0xa   : > { %p2066_p6 = por %p112_p3, %p40_p0  ;;  %s1942_s21 = smov [#allocation6]  }
   0xb   : > { %s2720_s18 = scalar_select %p2061_p4, 1, 0 }
   0xc   : > { %s2721_s19 = scalar_select %p2066_p6, 1, 0 }
   0xd   : > { %p2071_p8 = pnand %p1619_p5, %p119_p7  ;;  %s132_s22 = sshll.u32 %s1942_s21, 4  ;;  %s133_s22 = int_to_ptr.vmem [resolvable:$true] %s132_s22 }
   0xe   : > { %s2079_s23 = sadd.s32 1, %s1940_s15   ;;  %s27_s27 = sadd.s32 1, %s1936_s14 }
   0xf   : > { %s2722_s20 = scalar_select %p2071_p8, 1, 0 }
  0x10   : > { %p1644_p10 = pneg %p2071_p8  ;;  %s24_s25 = ssub.s32 %s1940_s15, %s2079_s23 }
  0x11   : > { %p2089_p12 = scmp.eq.s32.totalorder %s24_s25, 0  ;;  %p34_p13 = scmp.ne.s32.totalorder %s1936_s14, %s1932_s13 }
  0x12   : > { %p2083_p11 = pnand %p1644_p10, %p2716_p1  ;;  %s1829_s28 = scalar_lea.vmem %s133_s22, 32 }
  0x13   : > { %p1830_p3 = scmp.ne.s32.totalorder %s133_s22, %s1829_s28  ;;  %p1837_p9 = scmp.lt.s32.totalorder %s133_s22, %s133_s22 }
  0x14   : > { %p1820_p0 = pneg %p2083_p11  ;;  %p1838_p2 = scmp.lt.s32.totalorder %s1829_s28, %s1829_s28 }
  0x16   : > { %p1832_p5 = pnand %p1830_p3, %p1820_p0  ;;  %p1839_p10 = por %p1838_p2, %p1837_p9 }
  0x18   : > { %p1833_p7 = pneg %p1832_p5 }
  0x1a   : > { %p1840_p1 = pnand %p1839_p10, %p1833_p7 }
  0x1c   : > { %1843 = shalt.err (!%p1840_p1)
}
  0x1d   : > { %1647 = dma.hbm_to_vmem [thread:$0]  (!%p2083_p11), %s2713_s1, 32, %s133_s22, [#allocation7]  }
  0x1e   : > { %s2106_s4 = scalar_select %p2089_p12, %s1936_s14, %s27_s27  }
  0x1f   : > { %p35_p1 = scmp.eq.s32.totalorder %s1940_s15, 0  ;;  %p2725_p2 = scmp.eq.s32.totalorder %s2052_s16, 1 }
  0x20   : > { %p1657_p0 = scmp.lt.s32.totalorder %s1940_s15, 2  ;;  %s146_s6 = sand.u32 1, %s1936_s14  }
  0x21   : > { %p2114_p9 = por %p2725_p2, %p34_p13  ;;  %p36_p3 = por %p35_p1, %p34_p13 }
  0x22   : > { %s1622_s7 = sshll.u32 %s146_s6, 3  ;;  %s1634_s8 = sshll.u32 %s1940_s15, 7 }
  0x23   : > { %s2726_s5 = scalar_select %p2114_p9, 1, 0 }
  0x24   : > { %s2127_s11 = scalar_lea.hbm %s2712_s0, %s1634_s8  ;;  %s150_s17 = scalar_lea.vmem [#allocation3], %s1622_s7 }
  0x25   : > { %s158_s21 = sshll.u32 %s150_s17, 4  ;;  %p2129_p11 = pnand %p1657_p0, %p36_p3  ;;  %s159_s21 = int_to_ptr.vmem [resolvable:$true] %s158_s21 }
  0x26   : > { %s147_s24 = scalar_lea.sflag [#allocation4], %s146_s6  ;;  %s1844_s25 = scalar_lea.hbm %s2127_s11, 128 }
  0x27   : > { %p1845_p12 = scmp.ne.s32.totalorder %s2127_s11, %s1844_s25  ;;  %p1846_p13 = pneg %p2129_p11 }
  0x28   : > { %s1849_s28 = scalar_lea.hbm %s2712_s0, 256  ;;  %p1850_p10 = scmp.lt.s32.totalorder %s2127_s11, %s2712_s0 }
  0x29   : > { %p1847_p5 = pnand %p1846_p13, %p1845_p12  ;;  %p1851_p1 = scmp.lt.s32.totalorder %s1849_s28, %s1844_s25 }
  0x2b   : > { %p1848_p7 = pneg %p1847_p5  ;;  %p1852_p2 = por %p1851_p1, %p1850_p10 }
  0x2d   : > { %p1853_p0 = pnand %p1852_p2, %p1848_p7 }
  0x2f   : > { %1856 = shalt.err (!%p1853_p0)
}
  0x30   : > { %s1857_s7 = scalar_lea.vmem %s159_s21, 128  ;;  %s1943_s6 = smov [#allocation3]  }
  0x31   : > { %p1858_p3 = scmp.ne.s32.totalorder %s159_s21, %s1857_s7  ;;  %s1862_s8 = sshll.u32 %s1943_s6, 4  ;;  %s1863_s8 = int_to_ptr.vmem [resolvable:$false] %s1862_s8 }
  0x32   : > { %s1864_s9 = scalar_lea.vmem %s1863_s8, 256  ;;  %p1865_p12 = scmp.lt.s32.totalorder %s159_s21, %s1863_s8 }
  0x33   : > { %p1860_p6 = pnand %p1858_p3, %p1846_p13  ;;  %p1866_p5 = scmp.lt.s32.totalorder %s1864_s9, %s1857_s7 }
  0x35   : > { %p1861_p9 = pneg %p1860_p6  ;;  %p1867_p4 = por %p1866_p5, %p1865_p12 }
  0x37   : > { %p1868_p8 = pnand %p1867_p4, %p1861_p9 }
  0x39   : > { %1871 = shalt.err (!%p1868_p8)
}
  0x3a   : > { %1651 = dma.hbm_to_vmem [thread:$0]  (!%p2129_p11), %s2127_s11, 128, %s159_s21, %s147_s24  }
  0x3b   : > { %p2728_p7 = scmp.ne.s32.totalorder %s2722_s20, 0 }
  0x3c   : > { %s2150_s10 = sand.u32 (!%p2728_p7), 1, %s1932_s13   ;;  %p2729_p4 = scmp.ne.s32.totalorder (!%p2728_p7), %s2720_s18, 0 }
  0x3d   : > { %167 = sbr.rel (%p2728_p7) target bundleno = 681 (0x2a9), region = 32  ;;  %s1626_s17 = sshll.u32 (!%p2728_p7), %s2150_s10, 3 }
  0x3e   : > { %s170_s25 = scalar_lea.sflag (!%p2728_p7), [#allocation4], %s2150_s10  ;;  %s2156_s26 = scalar_lea.vmem (!%p2728_p7), [#allocation3], %s1626_s17 }
  0x42   : > { %1915 = dma.done.wait (%p2729_p4), %s170_s25, 128  }
  0x43   : > { %1917 = vsyncadd (%p2729_p4), %s170_s25, 4294967168  ;;  %p2730_p6 = scmp.eq.s32.totalorder %s2052_s16, 0 }
  0x45   : > { %1919 = dma.done.wait (%p2730_p6), [#allocation7], 32   ;;  %p2731_p8 = pmov %p2730_p6 }
  0x46   : > { %v1944_v0 = vmov 8   ;;  %v1945_v1 = vmov 0   ;;  %vm204_vm0 = vcmask 1043456   ;;  %v2167_v2 = vld [vmem:[#allocation6] sm:$0x3]  ;;  %v200_v3 = vld [vmem:[%s2156_s26] sm:$0xff]  ;;  %v249_v19 = vlaneseq }
  0x47   : > { %1921 = vsyncadd (%p2731_p8), [#allocation7], 4294967264  ;;  %1767 = vset.pattern.permute.xlu0 %v1944_v0  ;;  %1759 = vset.pattern.permute.xlu1 %v1945_v1  ;;  %v202_v4 = vcombine.high %v200_v3, %v200_v3  ;;  %v221_v5 = vsel %vm204_vm0, %v200_v3, -inf  ;;  %v205_v6 = vsel %vm204_vm0, %v200_v3, 0.0  ;;  %v1946_v15 = vmov 9   ;;  %s1955_s18 = smov 51  }
  0x48   : > { %477 = vperm.xlu0 %1767, %v2167_v2   ;;  %300 = vperm.xlu1 %1759, %v2167_v2   ;;  %v222_v7 = vrot.slane %v221_v5, 4  ;;  %v206_v8 = vrot.slane %v205_v6, 4  ;;  %v1947_v16 = vmov 7   ;;  %v1948_v17 = vmov 1966171168   ;;  %s1996_s20 = smov 112  }
  0x49   : > { %v228_v9 = vsel %vm204_vm0, %v202_v4, -inf  ;;  %v212_v10 = vsel %vm204_vm0, %v202_v4, 0.0  ;;  %v247_v18 = vunpack.c.l.s4 %v1948_v17  ;;  %v2175_v29 = vshrl.u32 %v249_v19, 7  ;;  %s1998_s11 = smov 96   ;;  %s1999_s21 = smov 80  }
  0x4a   : > { %v223_v11 = vmax.f32 %v221_v5, %v222_v7  ;;  %v229_v12 = vrot.slane %v228_v9, 4  ;;  %v207_v13 = vadd.f32 %v206_v8, %v205_v6  ;;  %v213_v14 = vrot.slane %v212_v10, 4  ;;  %s2000_s22 = smov 64   ;;  %s2001_s24 = smov 48  }
  0x4b   : > { %v248_v28 = vunpack.c.0.s8 %v247_v18  ;;  %v1949_v30 = vmov 10   ;;  %v1950_v31 = vmov 14   ;;  %v1951_v44 = vmov 21   ;;  %s2002_s27 = smov 32   ;;  %s2004_s28 = smov 127  }
  0x4c   : > { %1769 = vset.pattern.permute.xlu0 %v1946_v15  ;;  %1760 = vset.pattern.permute.xlu1 %v1947_v16  ;;  %v224_v20 = vrot.slane %v223_v11, 2  ;;  %v230_v21 = vmax.f32 %v228_v9, %v229_v12  ;;  %v208_v22 = vrot.slane %v207_v13, 2  ;;  %v214_v23 = vadd.f32 %v213_v14, %v212_v10  ;;  %s2005_s29 = smov 126   ;;  %s2006_s30 = smov 125  }
  0x4d   : > { %651 = vperm.xlu0 %1769, %v2167_v2   ;;  %314 = vperm.xlu1 %1760, %v2167_v2   ;;  %v251_v41 = vsub.s32 %v248_v28, %v2175_v29  ;;  %v1952_v45 = vmov 11   ;;  %vm237_vm1 = vcmask 1041408   ;;  %vm238_vm2 = vcmask 1043458   ;;  %s2007_s7 = smov 124   ;;  %s2008_s6 = smov 123  }
  0x4e   : > { %v225_v24 = vmax.f32 %v223_v11, %v224_v20  ;;  %v231_v25 = vrot.slane %v230_v21, 2  ;;  %v209_v26 = vadd.f32 %v208_v22, %v207_v13  ;;  %v215_v27 = vrot.slane %v214_v23, 2  ;;  %vm239_vm4 = vmor %vm238_vm2, %vm237_vm1  ;;  %s2009_s8 = smov 122   ;;  %p2754_p11 = scmp.ne.s32.totalorder %s2726_s5, 0 }
  0x4f   : > { %vm240_vm3 = vcmask 832516   ;;  %v1953_v50 = vmov 0.0   ;;  %v1954_v51 = vmov 28   ;;  %v1956_v55 = vmov 35  }
  0x50   : > { %v226_v32 = vrot.slane %v225_v24, 1  ;;  %v232_v33 = vmax.f32 %v230_v21, %v231_v25  ;;  %v210_v34 = vrot.slane %v209_v26, 1  ;;  %v216_v35 = vadd.f32 %v215_v27, %v214_v23  ;;  %vm241_vm5 = vmor %vm240_vm3, %vm239_vm4 }
  0x51   : > { %1772 = vset.pattern.permute.xlu0 %v1949_v30  ;;  %1761 = vset.pattern.permute.xlu1 %v1950_v31  ;;  %242 = vst.msk [vmem:[#allocation2] sm:$0x3f] %vm241_vm5, %v1953_v50  ;;  %v1957_v56 = vmov 42   ;;  %v1958_v57 = vmov 30   ;;  %v1959_v58 = vmov 1   ;;  %v1960_v59 = vmov 24  }
  0x52   : > { %825 = vperm.xlu0 %1772, %v2167_v2   ;;  %334 = vperm.xlu1 %1761, %v2167_v2   ;;  %v227_v36 = vmax.f32 %v225_v24, %v226_v32  ;;  %v233_v37 = vrot.slane %v232_v33, 1  ;;  %v211_v38 = vadd.f32 %v210_v34, %v209_v26  ;;  %v217_v39 = vrot.slane %v216_v35, 1 }
  0x53   : > { %v1961_v60 = vmov 15   ;;  %v1962_v61 = vmov 25   ;;  %v1963_v62 = vmov 22   ;;  %v1964_v63 = vmov 31  }
  0x54   : > { %v234_v40 = vmax.f32 %v232_v33, %v233_v37  ;;  %v218_v42 = vadd.f32 %v217_v39, %v216_v35  ;;  %v235_v43 = vmul.f32 0.25, %v211_v38  ;;  %v1965_v0 = vmov 16  }
  0x55   : > { %v1966_v3 = vmov 26   ;;  %v1967_v4 = vmov 29   ;;  %v1968_v5 = vmov 39   ;;  %v1969_v6 = vmov 23  }
  0x56   : > { %1762 = vset.pattern.permute.xlu1 %v1951_v44  ;;  %1775 = vset.pattern.permute.xlu0 %v1952_v45  ;;  %v273_v46 = vcombine.low %v227_v36, %v234_v40  ;;  %v236_v47 = vmul.f32 0.25, %v218_v42  ;;  %v1970_v7 = vmov 45   ;;  %v1971_v8 = vmov 17  }
  0x57   : > { %354 = vperm.xlu1 %1762, %v2167_v2   ;;  %v1972_v9 = vmov 34   ;;  %v1973_v10 = vmov 36   ;;  %v1974_v11 = vmov 48   ;;  %v1975_v12 = vmov 18  }
  0x58   : > { %v280_v48 = vrot.slane %v273_v46, %v251_v41  ;;  %v245_v49 = vcombine.low %v235_v43, %v236_v47  ;;  %v1976_v13 = vmov 4   ;;  %v1977_v14 = vmov 12  }
  0x59   : > { %v1978_v15 = vmov 5   ;;  %v1979_v16 = vmov 43   ;;  %v1980_v17 = vmov 6   ;;  %v1981_v18 = vmov 37  }
  0x5a   : > { %v287_v52 = vrot.slane %v280_v48, %v251_v41  ;;  %v252_v53 = vrot.slane %v245_v49, %v251_v41  ;;  %v1982_v20 = vmov 19   ;;  %v1983_v21 = vmov 13  }
  0x5b   : > { %1763 = vset.pattern.permute.xlu1 %v1954_v51  ;;  %v1984_v22 = vmov 44   ;;  %v1985_v23 = vmov 32   ;;  %v1986_v24 = vmov 20   ;;  %v1987_v25 = vmov 38  }
  0x5c   : > { %374 = vperm.xlu1 %1763, %v2167_v2   ;;  %288 = vrot.lane.b32.xlu0 %v287_v52, %s1955_s18  ;;  %v259_v54 = vrot.slane %v252_v53, %v251_v41  ;;  %v1988_v28 = vmov 33   ;;  %v1989_v32 = vmov 27   ;;  %v1990_v35 = vmov 46  }
  0x5d   : > { %vm2227_vm6 = vcmp.ge.s32.totalorder %v249_v19, 51  ;;  %vm2232_vm7 = vcmp.lt.s32.totalorder %v249_v19, 307  ;;  %vm263_vm8 = vcmask 416768   ;;  %v1991_v41 = vmov 40  }
  0x5e   : > { %vm269_vm9 = vmand %vm2227_vm6, %vm2232_vm7  ;;  %v1992_v19 = vmov 269488144   ;;  %v1993_v48 = vmov 47   ;;  %v1994_v52 = vmov 41   ;;  %vm329_vm10 = vcmask 916480  }
  0x5f   : > { %v303_v43 = vunpack.c.l.s4 %v1992_v19  ;;  %vm349_vm11 = vcmask 785408   ;;  %vm369_vm12 = vcmask 654336   ;;  %vm389_vm13 = vcmask 523264  }
  0x60   : > { %1764 = vset.pattern.permute.xlu1 %v1956_v55  ;;  %260 = vrot.lane.b32.xlu0 %v259_v54, %s1955_s18  ;;  %vm409_vm14 = vcmask 392192   ;;  %vm429_vm15 = vcmask 261120   ;;  %s1635_s18 = sshll.u32 %s2052_s16, 7 }
  0x61   : > { %394 = vperm.xlu1 %1764, %v2167_v2   ;;  %v304_v49 = vunpack.c.0.s8 %v303_v43 }
  0x63   : > { %v2254_v51 = vsub.s32 %v304_v49, %v2175_v29 }
  0x64   : > { %983 = vperm.xlu0 %1775, %v2167_v2  }
  0x65   : > { %1765 = vset.pattern.permute.xlu1 %v1957_v56 }
  0x66   : > { %414 = vperm.xlu1 %1765, %v2167_v2  }
  0x68   : > { %1778 = vset.pattern.permute.xlu0 %v1958_v57  ;;  %v1995_v57 = vmov 2  }
  0x69   : > { %708 = vperm.xlu0 %1778, %v2167_v2  }
  0x6a   : > { %1766 = vset.pattern.permute.xlu1 %v1959_v58 }
  0x6b   : > { %464 = vperm.xlu1 %1766, %v2167_v2  }
  0x6d   : > { %1781 = vset.pattern.permute.xlu0 %v1960_v59 }
  0x6e   : > { %863 = vperm.xlu0 %1781, %v2167_v2  }
  0x6f   : > { %1768 = vset.pattern.permute.xlu1 %v1961_v60 }
  0x70   : > { %496 = vperm.xlu1 %1768, %v2167_v2  }
  0x72   : > { %1784 = vset.pattern.permute.xlu0 %v1962_v61 }
  0x73   : > { %1021 = vperm.xlu0 %1784, %v2167_v2  }
  0x74   : > { %1770 = vset.pattern.permute.xlu1 %v1963_v62 }
  0x75   : > { %515 = vperm.xlu1 %1770, %v2167_v2  }
  0x77   : > { %1787 = vset.pattern.permute.xlu0 %v1964_v63 }
  0x78   : > { %882 = vperm.xlu0 %1787, %v2167_v2  }
  0x79   : > { %1771 = vset.pattern.permute.xlu1 %v1965_v0  ;;  %v1997_v0 = vmov 3  }
  0x7a   : > { %670 = vperm.xlu1 %1771, %v2167_v2  }
  0x7c   : > { %1790 = vset.pattern.permute.xlu0 %v1966_v3 }
  0x7d   : > { %1195 = vperm.xlu0 %1790, %v2167_v2  }
  0x7e   : > { %1773 = vset.pattern.permute.xlu1 %v1967_v4 }
  0x7f   : > { %534 = vperm.xlu1 %1773, %v2167_v2  }
  0x81   : > { %1793 = vset.pattern.permute.xlu0 %v1968_v5 }
  0x82   : > { %1059 = vperm.xlu0 %1793, %v2167_v2  }
  0x83   : > { %1774 = vset.pattern.permute.xlu1 %v1969_v6 }
  0x84   : > { %689 = vperm.xlu1 %1774, %v2167_v2  }
  0x86   : > { %1796 = vset.pattern.permute.xlu0 %v1970_v7 }
  0x87   : > { %920 = vperm.xlu0 %1796, %v2167_v2  }
  0x88   : > { %1776 = vset.pattern.permute.xlu1 %v1971_v8 }
  0x89   : > { %844 = vperm.xlu1 %1776, %v2167_v2  }
  0x8b   : > { %1799 = vset.pattern.permute.xlu0 %v1972_v9 }
  0x8c   : > { %1388 = vperm.xlu0 %1799, %v2167_v2  }
  0x8d   : > { %1777 = vset.pattern.permute.xlu1 %v1973_v10 }
  0x8e   : > { %553 = vperm.xlu1 %1777, %v2167_v2  }
  0x90   : > { %1802 = vset.pattern.permute.xlu0 %v1974_v11 }
  0x91   : > { %1426 = vperm.xlu0 %1802, %v2167_v2  }
  0x92   : > { %1779 = vset.pattern.permute.xlu1 %v1975_v12 }
  0x93   : > { %1002 = vperm.xlu1 %1779, %v2167_v2  }
  0x95   : > { %1805 = vset.pattern.permute.xlu0 %v1976_v13 }
  0x96   : > { %970 = vperm.xlu0 %1805, %v2167_v2  }
  0x97   : > { %1780 = vset.pattern.permute.xlu1 %v1977_v14 }
  0x98   : > { %1157 = vperm.xlu1 %1780, %v2167_v2  }
  0x9a   : > { %1806 = vset.pattern.permute.xlu0 %v1978_v15 }
  0x9b   : > { %1144 = vperm.xlu0 %1806, %v2167_v2  }
  0x9c   : > { %1782 = vset.pattern.permute.xlu1 %v1979_v16 }
  0x9d   : > { %572 = vperm.xlu1 %1782, %v2167_v2  }
  0x9f   : > { %1807 = vset.pattern.permute.xlu0 %v1980_v17 }
  0xa0   : > { %1318 = vperm.xlu0 %1807, %v2167_v2  }
  0xa1   : > { %1783 = vset.pattern.permute.xlu1 %v1981_v18 }
  0xa2   : > { %727 = vperm.xlu1 %1783, %v2167_v2  }
  0xa4   : > { %1808 = vset.pattern.permute.xlu0 %v1974_v11 }
  0xa6   : > { %1785 = vset.pattern.permute.xlu1 %v1982_v20 }
  0xa7   : > { %1176 = vperm.xlu1 %1785, %v2167_v2  }
  0xab   : > { %1786 = vset.pattern.permute.xlu1 %v1983_v21 }
  0xac   : > { %1331 = vperm.xlu1 %1786, %v2167_v2  }
  0xb0   : > { %1788 = vset.pattern.permute.xlu1 %v1984_v22 }
  0xb1   : > { %746 = vperm.xlu1 %1788, %v2167_v2  }
  0xb5   : > { %1789 = vset.pattern.permute.xlu1 %v1985_v23 }
  0xb6   : > { %1040 = vperm.xlu1 %1789, %v2167_v2  }
  0xba   : > { %1791 = vset.pattern.permute.xlu1 %v1986_v24 }
  0xbb   : > { %1350 = vperm.xlu1 %1791, %v2167_v2  }
  0xbf   : > { %1792 = vset.pattern.permute.xlu1 %v1987_v25 }
  0xc0   : > { %901 = vperm.xlu1 %1792, %v2167_v2  }
  0xc3   : > { %v2216_v26 = vpop.permute.xlu1 %300  ;;  %v2218_v27 = vpop.permute.xlu0 %477 }
  0xc4   : > { %1794 = vset.pattern.permute.xlu1 %v1988_v28  ;;  %v485_v59 = vrot.slane %v2218_v27, %v2254_v51 }
  0xc5   : > { %1214 = vperm.xlu1 %1794, %v2167_v2  }
  0xc8   : > { %v315_v30 = vpop.permute.xlu1 %314  ;;  %v2221_v31 = vpop.permute.xlu0 %651 }
  0xc9   : > { %1795 = vset.pattern.permute.xlu1 %v1989_v32  ;;  %v322_v53 = vrot.slane %v315_v30, %v2254_v51  ;;  %v659_v7 = vrot.slane %v2221_v31, %v2254_v51 }
  0xca   : > { %1369 = vperm.xlu1 %1795, %v2167_v2  }
  0xcd   : > { %v2224_v33 = vpop.permute.xlu0 %825  ;;  %v335_v34 = vpop.permute.xlu1 %334 }
  0xce   : > { %1797 = vset.pattern.permute.xlu1 %v1990_v35  ;;  %v342_v58 = vrot.slane %v335_v34, %v2254_v51  ;;  %v833_v22 = vrot.slane %v2224_v33, %v2254_v51 }
  0xcf   : > { %1078 = vperm.xlu1 %1797, %v2167_v2  }
  0xd1   : > { %v289_v38 = vpop.permute.xlu0 %288 }
  0xd2   : > { %v290_v39 = vrot.slane %v289_v38, 7  ;;  %v355_v40 = vpop.permute.xlu1 %354 }
  0xd3   : > { %1798 = vset.pattern.permute.xlu1 %v1991_v41  ;;  %v362_v63 = vrot.slane %v355_v40, %v2254_v51 }
  0xd4   : > { %v291_v42 = vsel %vm263_vm8, %v290_v39, %v289_v38  ;;  %1233 = vperm.xlu1 %1798, %v2167_v2  }
  0xd5   : > { %294 = vst.msk [vmem:[#allocation2 + $0x1] ss:$2 sm:$0x7] %vm269_vm9, %v291_v42  ;;  %v261_v44 = vpop.permute.xlu0 %260 }
  0xd6   : > { %v262_v45 = vrot.slane %v261_v44, 7 }
  0xd7   : > { %v375_v46 = vpop.permute.xlu1 %374 }
  0xd8   : > { %v264_v47 = vsel %vm263_vm8, %v262_v45, %v261_v44  ;;  %1800 = vset.pattern.permute.xlu1 %v1993_v48  ;;  %v382_v5 = vrot.slane %v375_v46, %v2254_v51 }
  0xd9   : > { %270 = vst.msk [vmem:[#allocation2] ss:$2 sm:$0x7] %vm269_vm9, %v264_v47  ;;  %1252 = vperm.xlu1 %1800, %v2167_v2  }
  0xdc   : > { %v395_v50 = vpop.permute.xlu1 %394 }
  0xdd   : > { %1801 = vset.pattern.permute.xlu1 %v1994_v52  ;;  %v402_v11 = vrot.slane %v395_v50, %v2254_v51 }
  0xde   : > { %1407 = vperm.xlu1 %1801, %v2167_v2  }
  0xdf   : > { %v984_v30 = vpop.permute.xlu0 %983 }
  0xe0   : > { %v312_v54 = vld [vmem:[#allocation2] sm:$0x3f]  ;;  %v991_v32 = vrot.slane %v984_v30, %v2254_v51 }
  0xe1   : > { %v415_v55 = vpop.permute.xlu1 %414  ;;  %v324_v56 = vmul.f32 %v322_v53, %v312_v54  ;;  %v2263_v60 = vld [vmem:[#allocation2] sm:$0x3f]  ;;  %v344_v61 = vmul.f32 %v342_v58, %v312_v54  ;;  %v364_v4 = vmul.f32 %v362_v63, %v312_v54  ;;  %v384_v9 = vmul.f32 %v382_v5, %v312_v54 }
  0xe2   : > { %1803 = vset.pattern.permute.xlu1 %v1995_v57  ;;  %v487_v3 = vmul.f32 %v485_v59, %v2263_v60  ;;  %v2277_v10 = vld [vmem:[#allocation2] sm:$0x3f]  ;;  %v404_v14 = vmul.f32 %v402_v11, %v312_v54  ;;  %v422_v15 = vrot.slane %v415_v55, %v2254_v51 }
  0xe3   : > { %638 = vperm.xlu1 %1803, %v2167_v2   ;;  %326 = vrot.lane.b32.xlu0 %v324_v56, %s1996_s20  ;;  %v661_v13 = vmul.f32 %v659_v7, %v2277_v10  ;;  %v2295_v25 = vld [vmem:[#allocation2] sm:$0x3f] }
  0xe4   : > { %v424_v17 = vmul.f32 %v422_v15, %v312_v54  ;;  %v835_v28 = vmul.f32 %v833_v22, %v2295_v25  ;;  %v2303_v33 = vld [vmem:[#allocation2] sm:$0x3f]  ;;  %v709_v40 = vpop.permute.xlu0 %708 }
  0xe5   : > { %v993_v37 = vmul.f32 %v991_v32, %v2303_v33  ;;  %v716_v41 = vrot.slane %v709_v40, %v2254_v51  ;;  %v2326_v55 = vld [vmem:[#allocation2] sm:$0x3f] }
  0xe6   : > { %v2265_v62 = vpop.permute.xlu1 %464  ;;  %v2346_v15 = vld [vmem:[#allocation2] sm:$0x3f] }
  0xe7   : > { %1804 = vset.pattern.permute.xlu1 %v1997_v0  ;;  %346 = vrot.lane.b32.xlu0 %v344_v61, %s1998_s11  ;;  %v718_v44 = vmul.f32 %v716_v41, %v2277_v10 }
  0xe8   : > { %812 = vperm.xlu1 %1804, %v2167_v2  }
  0xe9   : > { %v864_v48 = vpop.permute.xlu0 %863 }
  0xea   : > { %v871_v49 = vrot.slane %v864_v48, %v2254_v51 }
  0xeb   : > { %v497_v6 = vpop.permute.xlu1 %496  ;;  %366 = vrot.lane.b32.xlu0 %v364_v4, %s1999_s21 }
  0xec   : > { %v504_v8 = vrot.slane %v497_v6, %v2254_v51  ;;  %489 = vrot.lane.b32.xlu1 %v487_v3, %s1996_s20  ;;  %v873_v54 = vmul.f32 %v871_v49, %v2295_v25 }
  0xee   : > { %v506_v2 = vmul.f32 %v504_v8, %v2263_v60  ;;  %v1022_v59 = vpop.permute.xlu0 %1021 }
  0xef   : > { %386 = vrot.lane.b32.xlu0 %v384_v9, %s2000_s22  ;;  %v1029_v61 = vrot.slane %v1022_v59, %v2254_v51 }
  0xf0   : > { %v516_v12 = vpop.permute.xlu1 %515  ;;  %508 = vrot.lane.b32.xlu1 %v506_v2, %s1998_s11 }
  0xf1   : > { %v523_v16 = vrot.slane %v516_v12, %v2254_v51  ;;  %v1031_v4 = vmul.f32 %v1029_v61, %v2303_v33 }
  0xf3   : > { %406 = vrot.lane.b32.xlu0 %v404_v14, %s2001_s24  ;;  %v525_v20 = vmul.f32 %v523_v16, %v2263_v60  ;;  %v883_v6 = vpop.permute.xlu0 %882 }
  0xf4   : > { %663 = vrot.lane.b32.xlu1 %v661_v13, %s1996_s20  ;;  %v890_v9 = vrot.slane %v883_v6, %v2254_v51 }
  0xf5   : > { %v671_v18 = vpop.permute.xlu1 %670 }
  0xf6   : > { %v678_v21 = vrot.slane %v671_v18, %v2254_v51  ;;  %v892_v14 = vmul.f32 %v890_v9, %v2295_v25 }
  0xf7   : > { %426 = vrot.lane.b32.xlu0 %v424_v17, %s2002_s27 }
  0xf8   : > { %527 = vrot.lane.b32.xlu1 %v525_v20, %s1999_s21  ;;  %v680_v23 = vmul.f32 %v678_v21, %v2277_v10  ;;  %v1196_v11 = vpop.permute.xlu0 %1195 }
  0xf9   : > { %v1203_v21 = vrot.slane %v1196_v11, %v2254_v51 }
  0xfa   : > { %v535_v24 = vpop.permute.xlu1 %534 }
  0xfb   : > { %v542_v27 = vrot.slane %v535_v24, %v2254_v51 }
  0xfc   : > { %682 = vrot.lane.b32.xlu1 %v680_v23, %s1998_s11 }
  0xfd   : > { %v544_v35 = vmul.f32 %v542_v27, %v2263_v60  ;;  %v1060_v18 = vpop.permute.xlu0 %1059  ;;  %v1205_v27 = vmul.f32 %v1203_v21, %v2326_v55 }
  0xff   : > { %v690_v31 = vpop.permute.xlu1 %689 }
 0x100   : > { %v697_v34 = vrot.slane %v690_v31, %v2254_v51  ;;  %837 = vrot.lane.b32.xlu1 %v835_v28, %s1996_s20 }
 0x102   : > { %v699_v36 = vmul.f32 %v697_v34, %v2277_v10  ;;  %v921_v28 = vpop.permute.xlu0 %920  ;;  %v1067_v34 = vrot.slane %v1060_v18, %v2254_v51 }
 0x104   : > { %v845_v38 = vpop.permute.xlu1 %844  ;;  %546 = vrot.lane.b32.xlu1 %v544_v35, %s2000_s22  ;;  %701 = vrot.lane.b32.xlu0 %v699_v36, %s1999_s21 }
 0x105   : > { %v852_v39 = vrot.slane %v845_v38, %v2254_v51 }
 0x107   : > { %v854_v42 = vmul.f32 %v852_v39, %v2295_v25  ;;  %v1389_v35 = vpop.permute.xlu0 %1388  ;;  %v1069_v39 = vmul.f32 %v1067_v34, %v2303_v33 }
 0x108   : > { %995 = vrot.lane.b32.xlu1 %v993_v37, %s1996_s20 }
 0x109   : > { %v554_v19 = vpop.permute.xlu1 %553  ;;  %856 = vrot.lane.b32.xlu0 %v854_v42, %s1998_s11 }
 0x10a   : > { %v561_v43 = vrot.slane %v554_v19, %v2254_v51 }
 0x10c   : > { %v563_v45 = vmul.f32 %v561_v43, %v2263_v60  ;;  %v1427_v41 = vpop.permute.xlu0 %1426  ;;  %v928_v43 = vrot.slane %v921_v28, %v2254_v51 }
 0x10d   : > { %720 = vrot.lane.b32.xlu0 %v718_v44, %s2000_s22 }
 0x10e   : > { %v1003_v46 = vpop.permute.xlu1 %1002  ;;  %565 = vrot.lane.b32.xlu1 %v563_v45, %s2001_s24  ;;  %v930_v48 = vmul.f32 %v928_v43, %v2295_v25 }
 0x10f   : > { %v1010_v47 = vrot.slane %v1003_v46, %v2254_v51 }
 0x111   : > { %v1012_v50 = vmul.f32 %v1010_v47, %v2303_v33  ;;  %v2372_v45 = vpop.permute.xlu0 %970 }
 0x113   : > { %v1158_v52 = vpop.permute.xlu1 %1157  ;;  %1014 = vrot.lane.b32.xlu1 %v1012_v50, %s1998_s11 }
 0x114   : > { %v1165_v53 = vrot.slane %v1158_v52, %v2254_v51 }
 0x116   : > { %v1167_v56 = vmul.f32 %v1165_v53, %v2326_v55  ;;  %v2380_v52 = vpop.permute.xlu0 %1144 }
 0x117   : > { %875 = vrot.lane.b32.xlu1 %v873_v54, %s1999_s21  ;;  %v1396_v54 = vrot.slane %v1389_v35, %v2254_v51 }
 0x118   : > { %v573_v57 = vpop.permute.xlu1 %572  ;;  %1169 = vrot.lane.b32.xlu0 %v1167_v56, %s1996_s20 }
 0x119   : > { %v580_v58 = vrot.slane %v573_v57, %v2254_v51  ;;  %v1398_v59 = vmul.f32 %v1396_v54, %v2346_v15 }
 0x11b   : > { %v582_v63 = vmul.f32 %v580_v58, %v2263_v60  ;;  %v2388_v61 = vpop.permute.xlu0 %1318 }
 0x11d   : > { %v728_v0 = vpop.permute.xlu1 %727  ;;  %584 = vrot.lane.b32.xlu0 %v582_v63, %s2002_s27 }
 0x11e   : > { %v735_v3 = vrot.slane %v728_v0, %v2254_v51 }
 0x120   : > { %v737_v5 = vmul.f32 %v735_v3, %v2277_v10 }
 0x121   : > { %1033 = vrot.lane.b32.xlu0 %v1031_v4, %s1999_s21 }
 0x122   : > { %v1177_v7 = vpop.permute.xlu1 %1176  ;;  %739 = vrot.lane.b32.xlu1 %v737_v5, %s2001_s24  ;;  %v297_v5 = vld [vmem:[#allocation2] sm:$0xf] }
 0x123   : > { %v1184_v8 = vrot.slane %v1177_v7, %v2254_v51  ;;  %v308_v7 = vrot.slane %v2216_v26, %v2254_v51 }
 0x125   : > { %v1186_v2 = vmul.f32 %v1184_v8, %v2326_v55  ;;  %v1434_v8 = vrot.slane %v1427_v41, %v2254_v51  ;;  %v310_v11 = vmul.f32 %v308_v7, %v297_v5 }
 0x127   : > { %v1332_v12 = vpop.permute.xlu1 %1331  ;;  %1188 = vrot.lane.b32.xlu1 %v1186_v2, %s1998_s11 }
 0x128   : > { %v1339_v13 = vrot.slane %v1332_v12, %v2254_v51 }
 0x12a   : > { %v1341_v16 = vmul.f32 %v1339_v13, %v2346_v15 }
 0x12b   : > { %894 = vrot.lane.b32.xlu1 %v892_v14, %s2000_s22 }
 0x12c   : > { %v747_v17 = vpop.permute.xlu1 %746  ;;  %1343 = vrot.lane.b32.xlu0 %v1341_v16, %s1996_s20  ;;  %s199_s20 = scalar_lea.vmem [#allocation8], %s1626_s17 }
 0x12d   : > { %v754_v20 = vrot.slane %v747_v17, %v2254_v51  ;;  %v1436_v17 = vmul.f32 %v1434_v8, %v2346_v15 }
 0x12f   : > { %v756_v22 = vmul.f32 %v754_v20, %v2277_v10 }
 0x131   : > { %v1041_v23 = vpop.permute.xlu1 %1040  ;;  %758 = vrot.lane.b32.xlu0 %v756_v22, %s2002_s27 }
 0x132   : > { %v1048_v24 = vrot.slane %v1041_v23, %v2254_v51 }
 0x134   : > { %v1050_v30 = vmul.f32 %v1048_v24, %v2303_v33 }
 0x135   : > { %1207 = vrot.lane.b32.xlu0 %v1205_v27, %s1999_s21 }
 0x136   : > { %v1351_v31 = vpop.permute.xlu1 %1350  ;;  %1052 = vrot.lane.b32.xlu1 %v1050_v30, %s2000_s22 }
 0x137   : > { %v1358_v32 = vrot.slane %v1351_v31, %v2254_v51 }
 0x139   : > { %v1360_v36 = vmul.f32 %v1358_v32, %v2346_v15 }
 0x13b   : > { %v902_v37 = vpop.permute.xlu1 %901  ;;  %1362 = vrot.lane.b32.xlu1 %v1360_v36, %s1998_s11  ;;  %s1538_s11 = sshll.u32 %s199_s20, 4  ;;  %s1539_s11 = int_to_ptr.vmem [resolvable:$true] %s1538_s11 }
 0x13c   : > { %v909_v38 = vrot.slane %v902_v37, %v2254_v51 }
 0x13e   : > { %v911_v40 = vmul.f32 %v909_v38, %v2295_v25 }
 0x13f   : > { %1071 = vrot.lane.b32.xlu1 %v1069_v39, %s2001_s24 }
 0x140   : > { %v1215_v42 = vpop.permute.xlu1 %1214  ;;  %913 = vrot.lane.b32.xlu0 %v911_v40, %s2001_s24 }
 0x141   : > { %v1222_v19 = vrot.slane %v1215_v42, %v2254_v51 }
 0x143   : > { %v1224_v44 = vmul.f32 %v1222_v19, %v2326_v55 }
 0x145   : > { %v1370_v46 = vpop.permute.xlu1 %1369  ;;  %1226 = vrot.lane.b32.xlu0 %v1224_v44, %s2000_s22 }
 0x146   : > { %v1377_v47 = vrot.slane %v1370_v46, %v2254_v51 }
 0x148   : > { %v1379_v49 = vmul.f32 %v1377_v47, %v2346_v15 }
 0x149   : > { %932 = vrot.lane.b32.xlu0 %v930_v48, %s2002_s27 }
 0x14a   : > { %v1079_v50 = vpop.permute.xlu1 %1078  ;;  %1381 = vrot.lane.b32.xlu1 %v1379_v49, %s1999_s21 }
 0x14b   : > { %v1086_v53 = vrot.slane %v1079_v50, %v2254_v51 }
 0x14d   : > { %v1088_v56 = vmul.f32 %v1086_v53, %v2303_v33 }
 0x14f   : > { %v1234_v57 = vpop.permute.xlu1 %1233  ;;  %1090 = vrot.lane.b32.xlu1 %v1088_v56, %s2002_s27 }
 0x150   : > { %v1241_v58 = vrot.slane %v1234_v57, %v2254_v51  ;;  %v472_v57 = vrot.slane %v2265_v62, %v2254_v51  ;;  %v2003_v62 = vmov 1983009808  }
 0x152   : > { %v1243_v63 = vmul.f32 %v1241_v58, %v2326_v55 }
 0x153   : > { %1400 = vrot.lane.b32.xlu1 %v1398_v59, %s2000_s22 }
 0x154   : > { %v1253_v0 = vpop.permute.xlu1 %1252  ;;  %1245 = vrot.lane.b32.xlu0 %v1243_v63, %s2001_s24 }
 0x155   : > { %v1260_v3 = vrot.slane %v1253_v0, %v2254_v51  ;;  %v327_v4 = vpop.permute.xlu0 %326 }
 0x156   : > { %v328_v6 = vrot.slane %v327_v4, 2 }
 0x157   : > { %v1262_v9 = vmul.f32 %v1260_v3, %v2326_v55 }
 0x158   : > { %v330_v2 = vsel %vm329_vm10, %v327_v4, %v328_v6  ;;  %v474_v4 = vmul.f32 %v472_v57, %v2263_v60 }
 0x159   : > { %v1408_v12 = vpop.permute.xlu1 %1407  ;;  %1264 = vrot.lane.b32.xlu0 %v1262_v9, %s2002_s27  ;;  %v347_v13 = vpop.permute.xlu0 %346  ;;  %v332_v18 = vadd.f32 %v330_v2, %v310_v11 }
 0x15a   : > { %v1415_v14 = vrot.slane %v1408_v12, %v2254_v51  ;;  %v348_v16 = vrot.slane %v347_v13, 2  ;;  %v449_v12 = vunpack.c.l.s4 %v2003_v62 }
 0x15c   : > { %v1417_v26 = vmul.f32 %v1415_v14, %v2346_v15  ;;  %v350_v20 = vsel %vm349_vm11, %v347_v13, %v348_v16 }
 0x15d   : > { %v352_v21 = vadd.f32 %v350_v20, %v332_v18  ;;  %1438 = vrot.lane.b32.xlu0 %v1436_v17, %s2002_s27  ;;  %v367_v22 = vpop.permute.xlu0 %366  ;;  %v450_v18 = vunpack.c.0.s8 %v449_v12  ;;  %s1524_s27 = scalar_lea.sflag [#allocation5], %s2150_s10 }
 0x15e   : > { %v368_v23 = vrot.slane %v367_v22, 2  ;;  %v2405_v24 = vpop.permute.xlu1 %638  ;;  %1419 = vrot.lane.b32.xlu1 %v1417_v26, %s2001_s24  ;;  %s1536_s24 = scalar_lea.hbm %s2715_s3, %s1635_s18 }
 0x160   : > { %v370_v27 = vsel %vm369_vm12, %v367_v22, %v368_v23 }
 0x161   : > { %v372_v28 = vadd.f32 %v370_v27, %v352_v21  ;;  %v387_v30 = vpop.permute.xlu0 %386  ;;  %v2436_v27 = vsub.s32 %v450_v18, %v2175_v29 }
 0x162   : > { %v388_v31 = vrot.slane %v387_v30, 2 }
 0x163   : > { %v2409_v32 = vpop.permute.xlu1 %812 }
 0x164   : > { %v390_v34 = vsel %vm389_vm13, %v387_v30, %v388_v31  ;;  %v646_v31 = vrot.slane %v2405_v24, %v2254_v51 }
 0x165   : > { %v392_v35 = vadd.f32 %v390_v34, %v372_v28  ;;  %v407_v36 = vpop.permute.xlu0 %406 }
 0x166   : > { %v408_v37 = vrot.slane %v407_v36, 2 }
 0x167   : > { %v490_v38 = vpop.permute.xlu1 %489 }
 0x168   : > { %v410_v39 = vsel %vm409_vm14, %v407_v36, %v408_v37  ;;  %v491_v56 = vrot.slane %v490_v38, 2 }
 0x169   : > { %v412_v40 = vadd.f32 %v410_v39, %v392_v35  ;;  %v427_v41 = vpop.permute.xlu0 %426 }
 0x16a   : > { %v428_v42 = vrot.slane %v427_v41, 2  ;;  %v492_v63 = vsel %vm329_vm10, %v490_v38, %v491_v56  ;;  %v648_v38 = vmul.f32 %v646_v31, %v2277_v10 }
 0x16b   : > { %v509_v19 = vpop.permute.xlu1 %508  ;;  %v494_v8 = vadd.f32 %v492_v63, %v474_v4 }
 0x16c   : > { %v430_v43 = vsel %vm429_vm15, %v427_v41, %v428_v42  ;;  %v510_v59 = vrot.slane %v509_v19, 2 }
 0x16d   : > { %v2414_v44 = vadd.f32 %v430_v43, %v412_v40 }
 0x16e   : > { %v511_v6 = vsel %vm349_vm11, %v509_v19, %v510_v59 }
 0x16f   : > { %v664_v46 = vpop.permute.xlu1 %663  ;;  %v513_v13 = vadd.f32 %v511_v6, %v494_v8 }
 0x170   : > { %v665_v30 = vrot.slane %v664_v46, 2 }
 0x172   : > { %v666_v37 = vsel %vm329_vm10, %v664_v46, %v665_v30 }
 0x173   : > { %v528_v47 = vpop.permute.xlu1 %527  ;;  %v668_v41 = vadd.f32 %v666_v37, %v648_v38 }
 0x174   : > { %v529_v0 = vrot.slane %v528_v47, 2 }
 0x176   : > { %v702_v49 = vpop.permute.xlu0 %701  ;;  %v530_v9 = vsel %vm369_vm12, %v528_v47, %v529_v0 }
 0x177   : > { %v683_v48 = vpop.permute.xlu1 %682  ;;  %v532_v16 = vadd.f32 %v530_v9, %v513_v13  ;;  %v703_v24 = vrot.slane %v702_v49, 2  ;;  %v820_v9 = vrot.slane %v2409_v32, %v2254_v51 }
 0x178   : > { %v684_v36 = vrot.slane %v683_v48, 2 }
 0x179   : > { %v704_v56 = vsel %vm369_vm12, %v702_v49, %v703_v24  ;;  %v822_v12 = vmul.f32 %v820_v9, %v2295_v25 }
 0x17a   : > { %v685_v39 = vsel %vm349_vm11, %v683_v48, %v684_v36 }
 0x17b   : > { %v2416_v50 = vpop.permute.xlu1 %837  ;;  %v2418_v54 = vpop.permute.xlu0 %856  ;;  %v687_v43 = vadd.f32 %v685_v39, %v668_v41 }
 0x17c   : > { %v839_v49 = vrot.slane %v2416_v50, 2  ;;  %v858_v13 = vrot.slane %v2418_v54, 2 }
 0x17d   : > { %v706_v59 = vadd.f32 %v704_v56, %v687_v43 }
 0x17e   : > { %v840_v62 = vsel %vm329_vm10, %v2416_v50, %v839_v49  ;;  %v859_v32 = vsel %vm349_vm11, %v2418_v54, %v858_v13 }
 0x17f   : > { %v547_v53 = vpop.permute.xlu1 %546  ;;  %v721_v3 = vpop.permute.xlu0 %720  ;;  %v842_v18 = vadd.f32 %v840_v62, %v822_v12 }
 0x180   : > { %v548_v7 = vrot.slane %v547_v53, 2  ;;  %v722_v19 = vrot.slane %v721_v3, 2 }
 0x182   : > { %v549_v14 = vsel %vm389_vm13, %v547_v53, %v548_v7  ;;  %v723_v57 = vsel %vm389_vm13, %v721_v3, %v722_v19 }
 0x183   : > { %v2422_v58 = vpop.permute.xlu1 %995  ;;  %v551_v60 = vadd.f32 %v549_v14, %v532_v16  ;;  %v725_v10 = vadd.f32 %v723_v57, %v706_v59 }
 0x187   : > { %v566_v5 = vpop.permute.xlu1 %565 }
 0x188   : > { %v567_v2 = vrot.slane %v566_v5, 2 }
 0x18a   : > { %v2428_v11 = vpop.permute.xlu0 %1169  ;;  %v568_v17 = vsel %vm409_vm14, %v566_v5, %v567_v2 }
 0x18b   : > { %v2432_v26 = vpop.permute.xlu1 %1014  ;;  %v570_v22 = vadd.f32 %v568_v17, %v551_v60  ;;  %v997_v60 = vrot.slane %v2422_v58, 2 }
 0x18c   : > { %v1016_v50 = vrot.slane %v2432_v26, 2 }
 0x18d   : > { %v998_v31 = vsel %vm329_vm10, %v2422_v58, %v997_v60 }
 0x18e   : > { %v1017_v54 = vsel %vm349_vm11, %v2432_v26, %v1016_v50  ;;  %v1152_v26 = vrot.slane %v2380_v52, %v2254_v51 }
 0x18f   : > { %v585_v20 = vpop.permute.xlu0 %584  ;;  %v876_v34 = vpop.permute.xlu1 %875 }
 0x190   : > { %v586_v21 = vrot.slane %v585_v20, 2  ;;  %v877_v14 = vrot.slane %v876_v34, 2  ;;  %v1154_v52 = vmul.f32 %v1152_v26, %v2326_v55 }
 0x192   : > { %v587_v23 = vsel %vm429_vm15, %v585_v20, %v586_v21  ;;  %v978_v21 = vrot.slane %v2372_v45, %v2254_v51  ;;  %v878_v25 = vsel %vm369_vm12, %v876_v34, %v877_v14 }
 0x193   : > { %v2438_v28 = vadd.f32 %v587_v23, %v570_v22  ;;  %v1034_v40 = vpop.permute.xlu0 %1033  ;;  %v861_v23 = vadd.f32 %v859_v32, %v842_v18 }
 0x194   : > { %v740_v42 = vpop.permute.xlu1 %739  ;;  %v1035_v36 = vrot.slane %v1034_v40, 2  ;;  %v980_v39 = vmul.f32 %v978_v21, %v2303_v33 }
 0x195   : > { %v2444_v35 = vrot.slane %v2438_v28, %v2436_v27  ;;  %v741_v47 = vrot.slane %v740_v42, 2  ;;  %v880_v45 = vadd.f32 %v878_v25, %v861_v23 }
 0x196   : > { %v1000_v34 = vadd.f32 %v998_v31, %v980_v39  ;;  %v1036_v43 = vsel %vm369_vm12, %v1034_v40, %v1035_v36 }
 0x197   : > { %621 = vrot.lane.b32.xlu1 %v2444_v35, %s2004_s28  ;;  %v742_v46 = vsel %vm409_vm14, %v740_v42, %v741_v47 }
 0x198   : > { %v744_v4 = vadd.f32 %v742_v46, %v725_v10  ;;  %v1019_v57 = vadd.f32 %v1017_v54, %v1000_v34  ;;  %v1171_v46 = vrot.slane %v2428_v11, 2 }
 0x199   : > { %v2456_v63 = vpop.permute.xlu1 %1188 }
 0x19d   : > { %v895_v7 = vpop.permute.xlu1 %894 }
 0x19e   : > { %v2451_v53 = vpop.permute.xlu0 %1343  ;;  %v896_v20 = vrot.slane %v895_v7, 2 }
 0x19f   : > { %v1345_v60 = vrot.slane %v2451_v53, 2 }
 0x1a0   : > { %v897_v37 = vsel %vm389_vm13, %v895_v7, %v896_v20 }
 0x1a1   : > { %v899_v24 = vadd.f32 %v897_v37, %v880_v45  ;;  %v1346_v31 = vsel %vm329_vm10, %v2451_v53, %v1345_v60  ;;  %v296_v60 = vld [vmem:[%s2714_s2] sm:$0x3] }
 0x1a2   : > { %vm590_vm0 = vcmp.ge.s32.totalorder %v296_v60, 2  ;;  %vm591_vm2 = vcmp.le.s32.totalorder %v296_v60, 17  ;;  %vm433_vm3 = vcmp.ge.s32.totalorder %v296_v60, 3  ;;  %vm434_vm4 = vcmp.le.s32.totalorder %v296_v60, 18 }
 0x1a3   : > { %v759_v48 = vpop.permute.xlu0 %758  ;;  %vm592_vm5 = vmand %vm590_vm0, %vm591_vm2  ;;  %vm764_vm6 = vcmp.ge.s32.totalorder %v296_v60, 1  ;;  %vm765_vm7 = vcmp.le.s32.totalorder %v296_v60, 16  ;;  %vm1271_vm0 = vcmp.le.s32.totalorder %v296_v60, 13 }
 0x1a4   : > { %v760_v0 = vrot.slane %v759_v48, 2  ;;  %vm435_vm8 = vmand %vm433_vm3, %vm434_vm4  ;;  %vm1444_vm3 = vcmp.ge.s32.totalorder %v296_v60, 4294967293  ;;  %vm1445_vm4 = vcmp.le.s32.totalorder %v296_v60, 12 }
 0x1a5   : > { %vm766_vm9 = vmand %vm764_vm6, %vm765_vm7 }
 0x1a6   : > { %v761_v5 = vsel %vm429_vm15, %v759_v48, %v760_v0  ;;  %v1038_v48 = vadd.f32 %v1036_v43, %v1019_v57 }
 0x1a7   : > { %v2459_v6 = vadd.f32 %v761_v5, %v744_v4  ;;  %v1208_v2 = vpop.permute.xlu0 %1207  ;;  %v1190_v4 = vrot.slane %v2456_v63, 2 }
 0x1a8   : > { %v1053_v3 = vpop.permute.xlu1 %1052  ;;  %v1209_v9 = vrot.slane %v1208_v2, 2 }
 0x1a9   : > { %v2463_v8 = vrot.slane %v2459_v6, %v2436_v27  ;;  %v1054_v41 = vrot.slane %v1053_v3, 2  ;;  %v1191_v13 = vsel %vm349_vm11, %v2456_v63, %v1190_v4 }
 0x1aa   : > { %v1210_v55 = vsel %vm369_vm12, %v1208_v2, %v1209_v9 }
 0x1ab   : > { %795 = vrot.lane.b32.xlu0 %v2463_v8, %s2005_s29  ;;  %v1055_v33 = vsel %vm389_vm13, %v1053_v3, %v1054_v41  ;;  %v1172_v3 = vsel %vm329_vm10, %v2428_v11, %v1171_v46  ;;  %v1326_v11 = vrot.slane %v2388_v61, %v2254_v51  ;;  %v794_v4 = vcombine.high %v2463_v8, %v2463_v8 }
 0x1ac   : > { %v1057_v5 = vadd.f32 %v1055_v33, %v1038_v48  ;;  %v1174_v18 = vadd.f32 %v1172_v3, %v1154_v52  ;;  %vm627_vm10 = vcmask 1039360  }
 0x1ad   : > { %v2474_v16 = vpop.permute.xlu1 %1362  ;;  %v1328_v51 = vmul.f32 %v1326_v11, %v2346_v15 }
 0x1ae   : > { %v1193_v32 = vadd.f32 %v1191_v13, %v1174_v18  ;;  %v1364_v50 = vrot.slane %v2474_v16, 2 }
 0x1b0   : > { %v1212_v36 = vadd.f32 %v1210_v55, %v1193_v32  ;;  %v1365_v2 = vsel %vm349_vm11, %v2474_v16, %v1364_v50  ;;  %v605_v16 = vcombine.high %v2438_v28, %v2438_v28  ;;  %v593_v32 = vsel %vm592_vm5, 1, %v1945_v1 }
 0x1b1   : > { %v1072_v38 = vpop.permute.xlu1 %1071  ;;  %v2578_v50 = vsub.s32 0, %v2175_v29  ;;  %vm1096_vm11 = vcmp.ge.s32.totalorder %v296_v60, 4294967295  ;;  %vm801_vm5 = vcmask 1031168  }
 0x1b2   : > { %v914_v17 = vpop.permute.xlu0 %913  ;;  %v1073_v47 = vrot.slane %v1072_v38, 2 }
 0x1b3   : > { %v915_v22 = vrot.slane %v914_v17, 2 }
 0x1b4   : > { %v1074_v40 = vsel %vm409_vm14, %v1072_v38, %v1073_v47 }
 0x1b5   : > { %v916_v42 = vsel %vm409_vm14, %v914_v17, %v915_v22  ;;  %v1076_v12 = vadd.f32 %v1074_v40, %v1057_v5  ;;  %v779_v5 = vcombine.high %v2459_v6, %v2459_v6 }
 0x1b6   : > { %v918_v59 = vadd.f32 %v916_v42, %v899_v24 }
 0x1b7   : > { %v1227_v30 = vpop.permute.xlu0 %1226  ;;  %v793_v8 = vrot.slane %v779_v5, %v2436_v27 }
 0x1b8   : > { %v1228_v14 = vrot.slane %v1227_v30, 2 }
 0x1ba   : > { %v1229_v22 = vsel %vm389_vm13, %v1227_v30, %v1228_v14  ;;  %v1348_v30 = vadd.f32 %v1346_v31, %v1328_v51  ;;  %v597_v31 = vrot.slane %v593_v32, %v2578_v50 }
 0x1bb   : > { %v933_v19 = vpop.permute.xlu0 %932  ;;  %v1231_v38 = vadd.f32 %v1229_v22, %v1212_v36  ;;  %v767_v36 = vsel %vm766_vm9, 1, %v1945_v1 }
 0x1bc   : > { %v934_v58 = vrot.slane %v933_v19, 2  ;;  %v1382_v56 = vpop.permute.xlu1 %1381  ;;  %v1367_v42 = vadd.f32 %v1365_v2, %v1348_v30  ;;  %v454_v2 = vrot.slane %v2414_v44, %v2436_v27  ;;  %v771_v30 = vrot.slane %v767_v36, %v2578_v50 }
 0x1bd   : > { %v1383_v37 = vrot.slane %v1382_v56, 2 }
 0x1be   : > { %v935_v10 = vsel %vm429_vm15, %v933_v19, %v934_v58  ;;  %vm2616_vm9 = vcmp.eq.s32.totalorder %v771_v30, 1 }
 0x1bf   : > { %v2496_v0 = vadd.f32 %v935_v10, %v918_v59  ;;  %v1384_v41 = vsel %vm369_vm12, %v1382_v56, %v1383_v37  ;;  %v619_v10 = vrot.slane %v605_v16, %v2436_v27  ;;  %vm1097_vm12 = vcmp.le.s32.totalorder %v296_v60, 14 }
 0x1c0   : > { %v1386_v43 = vadd.f32 %v1384_v41, %v1367_v42 }
 0x1c1   : > { %v2502_v7 = vrot.slane %v2496_v0, %v2436_v27  ;;  %v1091_v49 = vpop.permute.xlu1 %1090  ;;  %v939_v40 = vcombine.high %v2496_v0, %v2496_v0 }
 0x1c2   : > { %v1092_v62 = vrot.slane %v1091_v49, 2 }
 0x1c3   : > { %955 = vrot.lane.b32.xlu1 %v2502_v7, %s2006_s30  ;;  %v953_v3 = vrot.slane %v939_v40, %v2436_v27 }
 0x1c4   : > { %v1093_v17 = vsel %vm429_vm15, %v1091_v49, %v1092_v62  ;;  %v620_v49 = vcombine.high %v2444_v35, %v2444_v35  ;;  %v954_v35 = vcombine.high %v2502_v7, %v2502_v7 }
 0x1c5   : > { %v2513_v20 = vadd.f32 %v1093_v17, %v1076_v12  ;;  %v1401_v23 = vpop.permute.xlu1 %1400 }
 0x1c6   : > { %v1246_v21 = vpop.permute.xlu0 %1245  ;;  %v1402_v39 = vrot.slane %v1401_v23, 2 }
 0x1c7   : > { %v1247_v25 = vrot.slane %v1246_v21, 2  ;;  %v1118_v63 = vrot.slane %v2513_v20, %v2436_v27  ;;  %v1111_v6 = vcombine.high %v2513_v20, %v2513_v20 }
 0x1c8   : > { %v1403_v24 = vsel %vm389_vm13, %v1401_v23, %v1402_v39  ;;  %v2584_v23 = vsub.s32 1, %v2175_v29  ;;  %vm2593_vm13 = vcmp.eq.s32.totalorder %v597_v31, 1 }
 0x1c9   : > { %1127 = vrot.lane.b32.xlu0 %v1118_v63, %s2007_s7  ;;  %v1248_v61 = vsel %vm409_vm14, %v1246_v21, %v1247_v25  ;;  %v1405_v46 = vadd.f32 %v1403_v24, %v1386_v43  ;;  %v1126_v9 = vcombine.high %v1118_v63, %v1118_v63  ;;  %v1125_v52 = vrot.slane %v1111_v6, %v2436_v27 }
 0x1ca   : > { %v1250_v53 = vadd.f32 %v1248_v61, %v1231_v38  ;;  %v436_v63 = vsel %vm435_vm8, 1, %v1945_v1  ;;  %v601_v51 = vrot.slane %v593_v32, %v2584_v23  ;;  %v455_v24 = vcombine.high %v454_v2, %v454_v2 }
 0x1cb   : > { %v1265_v45 = vpop.permute.xlu0 %1264  ;;  %v440_v37 = vrot.slane %v436_v63, %v2578_v50  ;;  %v444_v38 = vrot.slane %v436_v63, %v2584_v23 }
 0x1cc   : > { %v1266_v54 = vrot.slane %v1265_v45, 2  ;;  %vm2604_vm6 = vcmp.eq.s32.totalorder %v601_v51, 1 }
 0x1cd   : > { %vm2600_vm2 = vcmp.eq.s32.totalorder %v440_v37, 1  ;;  %vm2611_vm7 = vcmp.eq.s32.totalorder %v444_v38, 1 }
 0x1ce   : > { %v1267_v34 = vsel %vm429_vm15, %v1265_v45, %v1266_v54  ;;  %v775_v54 = vrot.slane %v767_v36, %v2584_v23 }
 0x1cf   : > { %v1269_v19 = vadd.f32 %v1267_v34, %v1250_v53  ;;  %v1439_v15 = vpop.permute.xlu0 %1438 }
 0x1d0   : > { %v1420_v47 = vpop.permute.xlu1 %1419  ;;  %v1440_v57 = vrot.slane %v1439_v15, 2 }
 0x1d1   : > { %v1292_v58 = vrot.slane %v1269_v19, %v2436_v27  ;;  %v1421_v59 = vrot.slane %v1420_v47, 2  ;;  %v1285_v0 = vcombine.high %v1269_v19, %v1269_v19 }
 0x1d2   : > { %v1441_v26 = vsel %vm429_vm15, %v1439_v15, %v1440_v57  ;;  %vm1270_vm15 = vcmp.ge.s32.totalorder %v296_v60, 4294967294 }
 0x1d3   : > { %v1422_v56 = vsel %vm409_vm14, %v1420_v47, %v1421_v59  ;;  %1301 = vrot.lane.b32.xlu1 %v1292_v58, %s2008_s6  ;;  %v1299_v62 = vrot.slane %v1285_v0, %v2436_v27  ;;  %v1300_v13 = vcombine.high %v1292_v58, %v1292_v58  ;;  %vm1098_vm14 = vmand %vm1096_vm11, %vm1097_vm12  ;;  %v458_v47 = vsel %vm2600_vm2, %v454_v2, 0.0 }
 0x1d4   : > { %v1424_v33 = vadd.f32 %v1422_v56, %v1405_v46  ;;  %v1099_v19 = vsel %vm1098_vm14, 1, %v1945_v1  ;;  %vm1272_vm8 = vmand %vm1270_vm15, %vm1271_vm0  ;;  %vm961_vm12 = vcmask 1022976   ;;  %vm1481_vm0 = vcmask 998400  }
 0x1d5   : > { %vm1446_vm11 = vmand %vm1444_vm3, %vm1445_vm4  ;;  %v1103_v56 = vrot.slane %v1099_v19, %v2578_v50  ;;  %vm1307_vm2 = vcmask 1006592  }
 0x1d6   : > { %v1443_v48 = vadd.f32 %v1441_v26, %v1424_v33  ;;  %v1273_v26 = vsel %vm1272_vm8, 1, %v1945_v1  ;;  %v1447_v40 = vsel %vm1446_vm11, 1, %v1945_v1 }
 0x1d7   : > { %625 = vrot.lane.b32.xlu1 %v619_v10, %s2004_s28  ;;  %v1107_v10 = vrot.slane %v1099_v19, %v2584_v23  ;;  %v1281_v0 = vrot.slane %v1273_v26, %v2584_v23  ;;  %vm2646_vm14 = vcmp.eq.s32.totalorder %v1103_v56, 1  ;;  %v1455_v60 = vrot.slane %v1447_v40, %v2584_v23 }
 0x1d8   : > { %v1466_v28 = vrot.slane %v1443_v48, %v2436_v27  ;;  %v1459_v14 = vcombine.high %v1443_v48, %v1443_v48  ;;  %v459_v48 = vsel %vm2611_vm7, %v455_v24, 0.0 }
 0x1d9   : > { %vm2650_vm15 = vcmp.eq.s32.totalorder %v1107_v10, 1  ;;  %vm2657_vm4 = vcmp.eq.s32.totalorder %v1281_v0, 1 }
 0x1da   : > { %1475 = vrot.lane.b32.xlu0 %v1466_v28, %s2009_s8  ;;  %v1474_v12 = vcombine.high %v1466_v28, %v1466_v28  ;;  %v1473_v17 = vrot.slane %v1459_v14, %v2436_v27 }
 0x1db   : > { %797 = vrot.lane.b32.xlu1 %v794_v4, %s2005_s29 }
 0x1de   : > { %623 = vrot.lane.b32.xlu0 %v620_v49, %s2004_s28  ;;  %s1872_s28 = scalar_lea.vmem %s1539_s11, 128 }
 0x1df   : > { %959 = vrot.lane.b32.xlu1 %v953_v3, %s2006_s30  ;;  %p1873_p9 = scmp.ne.s32.totalorder %s1539_s11, %s1872_s28 }
 0x1e1   : > { %p1874_p13 = pnand %p1873_p9, %p2754_p11 }
 0x1e2   : > { %799 = vrot.lane.b32.xlu0 %v793_v8, %s2005_s29  ;;  %s2010_s29 = smov [#allocation8]  }
 0x1e3   : > { %1129 = vrot.lane.b32.xlu1 %v1126_v9, %s2007_s7  ;;  %v1277_v9 = vrot.slane %v1273_v26, %v2578_v50  ;;  %p1875_p10 = pneg %p1874_p13 }
 0x1e5   : > { %vm1282_vm3 = vcmp.eq.s32.totalorder %v1277_v9, 1 }
 0x1e6   : > { %957 = vrot.lane.b32.xlu0 %v954_v35, %s2006_s30 }
 0x1e7   : > { %1305 = vrot.lane.b32.xlu1 %v1299_v62, %s2008_s6 }
 0x1ea   : > { %1131 = vrot.lane.b32.xlu0 %v1125_v52, %s2007_s7  ;;  %v1451_v52 = vrot.slane %v1447_v40, %v2578_v50 }
 0x1eb   : > { %1477 = vrot.lane.b32.xlu1 %v1474_v12, %s2009_s8 }
 0x1ee   : > { %1303 = vrot.lane.b32.xlu0 %v1300_v13, %s2008_s6 }
 0x1f2   : > { %1479 = vrot.lane.b32.xlu0 %v1473_v17, %s2009_s8 }
 0x209   : > { %v622_v7 = vpop.permute.xlu1 %621 }
 0x21d   : > { %v796_v20 = vpop.permute.xlu0 %795 }
 0x235   : > { %v2567_v18 = vpop.permute.xlu1 %955 }
 0x23b   : > { %v2574_v55 = vpop.permute.xlu0 %1127 }
 0x245   : > { %v2572_v11 = vpop.permute.xlu1 %1301 }
 0x249   : > { %v626_v21 = vpop.permute.xlu1 %625 }
 0x24c   : > { %v2580_v25 = vpop.permute.xlu0 %1475 }
 0x24d   : > { %v798_v22 = vpop.permute.xlu1 %797 }
 0x24e   : > { %v802_v57 = vsel %vm801_vm5, %v796_v20, %v798_v22 }
 0x24f   : > { %v806_v5 = vsel %vm2616_vm9, %v802_v57, 0.0 }
 0x250   : > { %v624_v61 = vpop.permute.xlu0 %623 }
 0x251   : > { %v628_v39 = vsel %vm627_vm10, %v622_v7, %v624_v61  ;;  %v960_v45 = vpop.permute.xlu1 %959  ;;  %v629_v27 = vsel %vm627_vm10, %v624_v61, %v626_v21  ;;  %vm2622_vm10 = vcmp.eq.s32.totalorder %v775_v54, 1 }
 0x252   : > { %v632_v53 = vsel %vm2593_vm13, %v628_v39, 0.0  ;;  %v633_v59 = vsel %vm2604_vm6, %v629_v27, 0.0  ;;  %vm1133_vm13 = vcmask 1014784   ;;  %vm1457_vm6 = vcmp.eq.s32.totalorder %v1455_v60, 1 }
 0x253   : > { %v634_v46 = vadd.f32 %v632_v53, %v458_v47  ;;  %v635_v49 = vadd.f32 %v633_v59, %v459_v48 }
 0x254   : > { %v800_v42 = vpop.permute.xlu0 %799 }
 0x255   : > { %v1130_v15 = vpop.permute.xlu1 %1129  ;;  %v803_v58 = vsel %vm801_vm5, %v798_v22, %v800_v42  ;;  %v808_v8 = vadd.f32 %v806_v5, %v634_v46  ;;  %vm1456_vm5 = vcmp.eq.s32.totalorder %v1451_v52, 1 }
 0x256   : > { %v807_v28 = vsel %vm2622_vm10, %v803_v58, 0.0  ;;  %v1134_v12 = vsel %vm1133_vm13, %v2574_v55, %v1130_v15 }
 0x257   : > { %v809_v6 = vadd.f32 %v807_v28, %v635_v49  ;;  %v1138_v20 = vsel %vm2646_vm14, %v1134_v12, 0.0  ;;  %v1516_v28 = vld [vmem:[%s2156_s26] sm:$0xff]  ;;  %s1876_s26 = sshll.u32 %s2010_s29, 4  ;;  %s1877_s26 = int_to_ptr.vmem [resolvable:$false] %s1876_s26 }
 0x258   : > { %v958_v33 = vpop.permute.xlu0 %957  ;;  %s1878_s16 = scalar_lea.vmem %s1877_s26, 256  ;;  %p1879_p1 = scmp.lt.s32.totalorder %s1539_s11, %s1877_s26 }
 0x259   : > { %v1306_v4 = vpop.permute.xlu1 %1305  ;;  %v962_v3 = vsel %vm961_vm12, %v2567_v18, %v958_v33  ;;  %v963_v13 = vsel %vm961_vm12, %v958_v33, %v960_v45  ;;  %p1880_p2 = scmp.lt.s32.totalorder %s1878_s16, %s1872_s28 }
 0x25a   : > { %v966_v14 = vadd.f32 %v962_v3, %v808_v8  ;;  %v967_v21 = vadd.f32 %v963_v13, %v809_v6 }
 0x25b   : > { %p1881_p0 = por %p1880_p2, %p1879_p1 }
 0x25c   : > { %v1132_v62 = vpop.permute.xlu0 %1131  ;;  %v1140_v50 = vadd.f32 %v1138_v20, %v966_v14 }
 0x25d   : > { %v1135_v17 = vsel %vm1133_vm13, %v1130_v15, %v1132_v62  ;;  %v1478_v7 = vpop.permute.xlu1 %1477  ;;  %p1882_p3 = pnand %p1881_p0, %p1875_p10 }
 0x25e   : > { %v1139_v55 = vsel %vm2650_vm15, %v1135_v17, 0.0  ;;  %v1482_v63 = vsel %vm1481_vm0, %v2580_v25, %v1478_v7 }
 0x25f   : > { %v1141_v37 = vadd.f32 %v1139_v55, %v967_v21  ;;  %v1486_v61 = vsel %vm1456_vm5, %v1482_v63, 0.0 }
 0x260   : > { %v1304_v32 = vpop.permute.xlu0 %1303 }
 0x261   : > { %v1308_v22 = vsel %vm1307_vm2, %v2572_v11, %v1304_v32  ;;  %v1309_v31 = vsel %vm1307_vm2, %v1304_v32, %v1306_v4 }
 0x262   : > { %v1312_v36 = vsel %vm1282_vm3, %v1308_v22, 0.0  ;;  %v1313_v23 = vsel %vm2657_vm4, %v1309_v31, 0.0 }
 0x263   : > { %v1314_v51 = vadd.f32 %v1312_v36, %v1140_v50  ;;  %v1315_v38 = vadd.f32 %v1313_v23, %v1141_v37 }
 0x264   : > { %v1480_v2 = vpop.permute.xlu0 %1479 }
 0x265   : > { %v1488_v29 = vadd.f32 %v1486_v61, %v1314_v51  ;;  %v1483_v39 = vsel %vm1481_vm0, %v1478_v7, %v1480_v2 }
 0x266   : > { %v1487_v45 = vsel %vm1457_vm6, %v1483_v39, 0.0 }
 0x267   : > { %v1490_v30 = vsel %vm237_vm1, %v1488_v29, 0.0  ;;  %v1489_v25 = vadd.f32 %v1487_v45, %v1315_v38 }
 0x268   : > { %v1491_v54 = vrot.slane %v1490_v30, 4 }
 0x269   : > { %v1497_v11 = vsel %vm237_vm1, %v1489_v25, 0.0 }
 0x26a   : > { %v1492_v41 = vadd.f32 %v1491_v54, %v1490_v30  ;;  %v1498_v44 = vrot.slane %v1497_v11, 4 }
 0x26c   : > { %v1493_v27 = vrot.slane %v1492_v41, 2  ;;  %v1499_v53 = vadd.f32 %v1498_v44, %v1497_v11 }
 0x26e   : > { %v1494_v42 = vadd.f32 %v1493_v27, %v1492_v41  ;;  %v1500_v34 = vrot.slane %v1499_v53, 2 }
 0x270   : > { %v1495_v24 = vrot.slane %v1494_v42, 1  ;;  %v1501_v19 = vadd.f32 %v1500_v34, %v1499_v53 }
 0x272   : > { %v1496_v15 = vadd.f32 %v1495_v24, %v1494_v42  ;;  %v1502_v43 = vrot.slane %v1501_v19, 1 }
 0x274   : > { %v1504_v47 = vsub.f32 0.0, %v1496_v15  ;;  %v1503_v16 = vadd.f32 %v1502_v43, %v1501_v19 }
 0x276   : > { %v1506_v58 = vmul.f32 1.442695, %v1504_v47  ;;  %v1505_v57 = vsub.f32 0.0, %v1503_v16 }
 0x278   : > { %1810 = vpow2.f32 %v1506_v58  ;;  %v1508_v59 = vmul.f32 1.442695, %v1505_v57 }
 0x27a   : > { %1812 = vpow2.f32 %v1508_v59 }
 0x285   : > { %v1811_v46 = vpop.eup %1810 }
 0x286   : > { %v1510_v56 = vadd.f32 1.0, %v1811_v46 }
 0x287   : > { %v1813_v33 = vpop.eup %1812 }
 0x288   : > { %v1511_v10 = vadd.f32 1.0, %v1813_v33  ;;  %1814 = vrcp.f32 %v1510_v56 }
 0x28a   : > { %1816 = vrcp.f32 %v1511_v10 }
 0x295   : > { %v1815_v26 = vpop.eup %1814 }
 0x297   : > { %v1817_v48 = vpop.eup %1816 }
 0x298   : > { %v1519_v4 = vcombine.low %v1815_v26, %v1817_v48 }
 0x29a   : > { %v1521_v40 = vmul.f32 %v1519_v4, %v1516_v28 }
 0x29c   : > { %1522 = vst [vmem:[%s199_s20] sm:$0xff] %v1521_v40 }
 0x29d   : > { %1885 = shalt.err (!%p1882_p3)
}
 0x29e   : > { %s1886_s17 = scalar_lea.hbm %s1536_s24, 128  ;;  %s1890_s7 = scalar_lea.hbm %s2715_s3, 256 }
 0x29f   : > { %p1887_p12 = scmp.ne.s32.totalorder %s1536_s24, %s1886_s17  ;;  %p1891_p4 = scmp.lt.s32.totalorder %s1536_s24, %s2715_s3 }
 0x2a0   : > { %p1892_p6 = scmp.lt.s32.totalorder %s1890_s7, %s1886_s17 }
 0x2a1   : > { %p1888_p5 = pnand %p1887_p12, %p2754_p11 }
 0x2a2   : > { %p1893_p8 = por %p1892_p6, %p1891_p4 }
 0x2a3   : > { %p1889_p7 = pneg %p1888_p5 }
 0x2a5   : > { %p1894_p9 = pnand %p1893_p8, %p1889_p7 }
 0x2a7   : > { %1897 = shalt.err (!%p1894_p9)
}
 0x2a8   : > { %1642 = dma.vmem_to_hbm [thread:$0]  (%p2754_p11), %s1539_s11, 128, %s1536_s24, %s1524_s27  }
 0x2a9 PF: > { %s1550_s9 = sand.u32 1, %s1928_s12   ;;  %p2755_p13 = scmp.ne.s32.totalorder %s2721_s19, 0 }
 0x2aa   : > { %p2756_p10 = scmp.ge.s32.totalorder %s1940_s15, 2  ;;  %s1551_s25 = scalar_lea.sflag [#allocation5], %s1550_s9 }
 0x2ac   : > { %p1653_p1 = pnand %p2756_p10, %p2755_p13 }
 0x2ae   : > { %p1654_p2 = pneg %p1653_p1 }
 0x2b0   : > { %1923 = dma.done.wait (%p1654_p2), %s1551_s25, 128  }
 0x2b1   : > { %1925 = vsyncadd (%p1654_p2), %s1551_s25, 4294967168  ;;  %p17_p0 = scmp.ge.s32.totalorder %s2079_s23, 4   ;;  %s2757_s12 = smov %s1932_s13 }
 0x2b2   : > { %s2758_s13 = smov %s1936_s14  ;;  %s2759_s14 = smov %s2106_s4 }
 0x2b3   : > { %s2760_s15 = smov %s2079_s23  ;;  %19 = sbr.rel (!%p17_p0) target bundleno = 6 (0x6), region = 82 }
 0x2b8   :  { %1556 = vsyncpa [#allocation4], 1 }
 0x2b9   :  { %1558 = vsyncpa [#allocation4 + $0x1], 1 }
 0x2ba   :  { %1559 = vsyncpa [#allocation7], 1 }
 0x2bb   :  { %1560 = vsyncpa [#allocation5], 1 }
 0x2bc   :  { %1562 = vsyncpa [#allocation5 + $0x1], 1 }

</bundles_post_ra>
